<compile_context>
chip_gen: v7x
topology: tpu7x:2x2x1
jax: 0.10.0
libtpu: 0.0.40
codegen_flags: <defaults>
</compile_context>

<pallas_src>
import functools

import jax
import jax.numpy as jnp
from jax import lax
from jax.experimental import pallas as pl
from jax.experimental.pallas import tpu as pltpu

LANE = 128  # TPU lane width; all feature axes are padded to a multiple of this.


def _round_up(v, m):
    return ((v + m - 1) // m) * m


def _pad2d(x, rows=None, cols=None):
    r = x.shape[0] if rows is None else rows
    c = x.shape[1] if cols is None else cols
    return jnp.pad(x, ((0, r - x.shape[0]), (0, c - x.shape[1])))


# --------------------------------------------------------------------------
# The single fused Pallas kernel
# --------------------------------------------------------------------------
def _uppst_kernel(
    a_ref,        # (N, N)        bf16  symmetric-normalized adjacency
    xcat_ref,     # (N, 2*CP)     bf16  [x | x_corrupted] padded features
    w1_ref, b1_ref,
    w2_ref, b2_ref,
    w3_ref, b3_ref,
    w4_ref, b4_ref,               # weights (.., HP) bf16, biases (1, HP) f32
    prelu_ref,    # (1, HP)       f32
    wdec_ref,     # (HP, CP)      bf16
    bdec_ref,     # (1, CP)       f32
    mut_ref,      # (CP, KP)      f32   mu^T, zero-padded
    pos_ref,      # (N, HP)       f32
    neg_ref,      # (N, HP)       f32
    sum_ref,      # (1, HP)       f32
    xrec_ref,     # (N, CP)       f32
    q_ref,        # (N, KP)       f32
    *, alpha, n_clusters, hp,
):
    a = a_ref[...]          # bf16 (N, N)
    h = xcat_ref[...]       # bf16 (N, 2*CP) -- pos | neg halves share weights

    def gcn(h_cat, w_ref, b_ref):
        """A_hat @ ([h_pos | h_neg] @ W) + b, batched along the lane axis."""
        w = w_ref[...]                                  # (C, H) bf16
        half = h_cat.shape[1] // 2
        xw_p = jnp.dot(h_cat[:, :half].astype(jnp.bfloat16), w,
                       preferred_element_type=jnp.float32)
        xw_n = jnp.dot(h_cat[:, half:].astype(jnp.bfloat16), w,
                       preferred_element_type=jnp.float32)
        xw = jnp.concatenate([xw_p, xw_n], axis=1).astype(jnp.bfloat16)
        out = jnp.dot(a, xw, preferred_element_type=jnp.float32)  # (N, 2H) f32
        b = b_ref[...]                                  # (1, H) f32
        return out + jnp.concatenate([b, b], axis=1)

    # ---- Encoder: 4 GCNConv layers + PReLU (applied to both halves) ----
    h = gcn(h, w1_ref, b1_ref)
    h = gcn(h, w2_ref, b2_ref)
    h = gcn(h, w3_ref, b3_ref)
    h = gcn(h, w4_ref, b4_ref)
    p = prelu_ref[...]
    p2 = jnp.concatenate([p, p], axis=1)
    h = jnp.where(h > 0.0, h, p2 * h)

    pos = h[:, :hp]
    neg = h[:, hp:]
    pos_ref[...] = pos
    neg_ref[...] = neg

    # ---- DGI summary: sigmoid(mean over nodes) of pos_z (fused, no re-read) ----
    m = jnp.mean(pos, axis=0, keepdims=True)            # (1, HP)
    sum_ref[...] = 1.0 / (1.0 + jnp.exp(-m))

    # ---- Decoder GCNConv: hidden -> in_channels ----
    xw = jnp.dot(pos.astype(jnp.bfloat16), wdec_ref[...],
                 preferred_element_type=jnp.float32).astype(jnp.bfloat16)
    xrec = jnp.dot(a, xw, preferred_element_type=jnp.float32) + bdec_ref[...]
    xrec_ref[...] = xrec                                 # (N, CP) f32

    # ---- Student-t soft assignment q via MXU distance ----
    mu_t = mut_ref[...]                                  # (CP, KP) f32
    xn2 = jnp.sum(xrec * xrec, axis=1, keepdims=True)    # (N, 1)
    mn2 = jnp.sum(mu_t * mu_t, axis=0, keepdims=True)    # (1, KP)
    xm = jnp.dot(xrec, mu_t, preferred_element_type=jnp.float32)   # (N, KP)
    d2 = jnp.maximum(xn2 + mn2 - 2.0 * xm, 0.0)
    q = 1.0 / (1.0 + d2 / alpha + 1e-08)
    # Reference: q ** (alpha + 1.0) / 2.0 then row-normalize; the /2 cancels.
    q = jnp.exp((alpha + 1.0) * jnp.log(q))
    # Mask out the zero-padded (fake) cluster columns before normalizing.
    col = lax.broadcasted_iota(jnp.int32, q.shape, 1)
    q = jnp.where(col < n_clusters, q, 0.0)
    q_ref[...] = q / jnp.sum(q, axis=1, keepdims=True)


# --------------------------------------------------------------------------
# Glue: GCN normalization (densified adjacency), parameter init, forward
# --------------------------------------------------------------------------
def build_norm_adj(edge_index, edge_weight, num_nodes):
    """Dense A_hat = D^{-1/2}(A + I)D^{-1/2}, A_hat[dst, src] = norm weight."""
    row = edge_index[0]
    col = edge_index[1]
    loop = jnp.arange(num_nodes, dtype=edge_index.dtype)
    row = jnp.concatenate([row, loop])
    col = jnp.concatenate([col, loop])
    w = jnp.concatenate(
        [edge_weight.astype(jnp.float32), jnp.ones((num_nodes,), jnp.float32)]
    )
    deg = jnp.zeros((num_nodes,), jnp.float32).at[col].add(w)
    dinv = jnp.where(deg > 0, 1.0 / jnp.sqrt(deg), 0.0)
    norm = dinv[row] * w * dinv[col]
    a_hat = jnp.zeros((num_nodes, num_nodes), jnp.float32).at[col, row].add(norm)
    return a_hat


def glorot(key, fan_in, fan_out):
    lim = (6.0 / (fan_in + fan_out)) ** 0.5
    return jax.random.uniform(key, (fan_in, fan_out), jnp.float32, -lim, lim)


def init_params(key, in_channels, hidden_channels, n_clusters):
    ks = jax.random.split(key, 8)
    return {
        # Encoder: 4 GCNConv layers + PReLU
        "w1": glorot(ks[0], in_channels, hidden_channels),
        "b1": jnp.zeros((1, hidden_channels), jnp.float32),
        "w2": glorot(ks[1], hidden_channels, hidden_channels),
        "b2": jnp.zeros((1, hidden_channels), jnp.float32),
        "w3": glorot(ks[2], hidden_channels, hidden_channels),
        "b3": jnp.zeros((1, hidden_channels), jnp.float32),
        "w4": glorot(ks[3], hidden_channels, hidden_channels),
        "b4": jnp.zeros((1, hidden_channels), jnp.float32),
        "prelu": jnp.full((1, hidden_channels), 0.25, jnp.float32),
        # Decoder GCNConv: hidden -> in_channels
        "w_dec": glorot(ks[4], hidden_channels, in_channels),
        "b_dec": jnp.zeros((1, in_channels), jnp.float32),
        # Cluster centers mu (n_clusters, in_channels)
        "mu": jax.random.normal(ks[5], (n_clusters, in_channels), jnp.float32),
    }


def uppst_forward(params, x, edge_index, edge_attr, perm, alpha=0.2):
    n, c_in = x.shape
    hidden = params["w1"].shape[1]
    k = params["mu"].shape[0]
    cp = _round_up(c_in, LANE)
    hp = _round_up(hidden, LANE)
    kp = _round_up(k, LANE)

    a_hat = build_norm_adj(edge_index, edge_attr, n).astype(jnp.bfloat16)

    # Positive + corrupted node features, lane-padded and batched on lanes.
    x_pad = _pad2d(x, cols=cp)
    x_cor = x_pad[perm]
    xcat = jnp.concatenate([x_pad, x_cor], axis=1).astype(jnp.bfloat16)

    # Lane-pad parameters (matmul operands in bf16, bias/PReLU/mu in f32).
    w1 = _pad2d(params["w1"], rows=cp, cols=hp).astype(jnp.bfloat16)
    w2 = _pad2d(params["w2"], rows=hp, cols=hp).astype(jnp.bfloat16)
    w3 = _pad2d(params["w3"], rows=hp, cols=hp).astype(jnp.bfloat16)
    w4 = _pad2d(params["w4"], rows=hp, cols=hp).astype(jnp.bfloat16)
    b1 = _pad2d(params["b1"], cols=hp)
    b2 = _pad2d(params["b2"], cols=hp)
    b3 = _pad2d(params["b3"], cols=hp)
    b4 = _pad2d(params["b4"], cols=hp)
    prelu = _pad2d(params["prelu"], cols=hp)
    wdec = _pad2d(params["w_dec"], rows=hp, cols=cp).astype(jnp.bfloat16)
    bdec = _pad2d(params["b_dec"], cols=cp)
    mu_t = _pad2d(params["mu"].T, rows=cp, cols=kp)      # (cp, kp) f32

    vmem = pl.BlockSpec(memory_space=pltpu.MemorySpace.VMEM)
    kernel = functools.partial(
        _uppst_kernel, alpha=float(alpha), n_clusters=k, hp=hp
    )
    pos_p, neg_p, sum_p, xrec_p, q_p = pl.pallas_call(
        kernel,
        out_shape=(
            jax.ShapeDtypeStruct((n, hp), jnp.float32),   # pos_z (padded)
            jax.ShapeDtypeStruct((n, hp), jnp.float32),   # neg_z (padded)
            jax.ShapeDtypeStruct((1, hp), jnp.float32),   # summary (padded)
            jax.ShapeDtypeStruct((n, cp), jnp.float32),   # x_rec (padded)
            jax.ShapeDtypeStruct((n, kp), jnp.float32),   # q (padded)
        ),
        in_specs=[vmem] * 14,
        out_specs=(vmem,) * 5,
    )(a_hat, xcat, w1, b1, w2, b2, w3, b3, w4, b4, prelu, wdec, bdec, mu_t)

    pos_z = pos_p[:, :hidden]
    neg_z = neg_p[:, :hidden]
    summary = sum_p[0, :hidden]            # match torch: (H,)
    x_rec = xrec_p[:, :c_in]
    q = q_p[:, :k]
    return pos_z, neg_z, summary, x_rec, q


# --------------------------------------------------------------------------
if __name__ == "__main__":
    N = 16            # nodes
    IN_CH = 8         # in_channels
    HIDDEN = 32       # hidden_channels
    K = 4             # n_clusters
    ALPHA = 0.2

    key = jax.random.PRNGKey(0)
    k_x, k_w, k_p, k_perm = jax.random.split(key, 4)

    # Node features
    x = jax.random.normal(k_x, (N, IN_CH), jnp.float32)

    # Bidirectional ring graph: 2N edges
    src = jnp.arange(N, dtype=jnp.int32)
    dst = (src + 1) % N
    edge_index = jnp.stack(
        [jnp.concatenate([src, dst]), jnp.concatenate([dst, src])], axis=0
    )  # (2, 2N)
    edge_attr = jax.random.uniform(k_w, (2 * N,), jnp.float32, 0.5, 1.5)

    # Deterministic corruption permutation
    perm = jax.random.permutation(k_perm, N)

    params = init_params(k_p, IN_CH, HIDDEN, K)

    pos_z, neg_z, summary, x_rec, q = uppst_forward(
        params, x, edge_index, edge_attr, perm, alpha=ALPHA
    )
    jax.block_until_ready((pos_z, neg_z, summary, x_rec, q))

    assert pos_z.shape == (N, HIDDEN)
    assert neg_z.shape == (N, HIDDEN)
    assert summary.shape == (HIDDEN,)
    assert x_rec.shape == (N, IN_CH)
    assert q.shape == (N, K)
    assert bool(jnp.all(jnp.isfinite(pos_z)))
    assert bool(jnp.all(jnp.isfinite(neg_z)))
    assert bool(jnp.all(jnp.isfinite(q)))
    # rows of q sum to 1
    assert bool(jnp.allclose(jnp.sum(q, axis=1), 1.0, atol=1e-5))

    print("KERNEL_OK")
</pallas_src>

<mosaic_0001>
module attributes {stable_mosaic.version = 11 : i64} {
  func.func @_uppst_kernel(%arg0: memref<16x16xbf16, #tpu.memory_space<vmem>>, %arg1: memref<16x256xbf16, #tpu.memory_space<vmem>>, %arg2: memref<128x128xbf16, #tpu.memory_space<vmem>>, %arg3: memref<1x128xf32, #tpu.memory_space<vmem>>, %arg4: memref<128x128xbf16, #tpu.memory_space<vmem>>, %arg5: memref<1x128xf32, #tpu.memory_space<vmem>>, %arg6: memref<128x128xbf16, #tpu.memory_space<vmem>>, %arg7: memref<1x128xf32, #tpu.memory_space<vmem>>, %arg8: memref<128x128xbf16, #tpu.memory_space<vmem>>, %arg9: memref<1x128xf32, #tpu.memory_space<vmem>>, %arg10: memref<1x128xf32, #tpu.memory_space<vmem>>, %arg11: memref<128x128xbf16, #tpu.memory_space<vmem>>, %arg12: memref<1x128xf32, #tpu.memory_space<vmem>>, %arg13: memref<128x128xf32, #tpu.memory_space<vmem>>, %arg14: memref<16x128xf32, #tpu.memory_space<vmem>>, %arg15: memref<16x128xf32, #tpu.memory_space<vmem>>, %arg16: memref<1x128xf32, #tpu.memory_space<vmem>>, %arg17: memref<16x128xf32, #tpu.memory_space<vmem>>, %arg18: memref<16x128xf32, #tpu.memory_space<vmem>>) attributes {dimension_semantics = [], scalar_prefetch = 0 : i64, scratch_operands = 0 : i64, tpu.core_type = #tpu.core_type<tc>} {
    %c0 = arith.constant 0 : index
    %c0_0 = arith.constant 0 : index
    %0 = vector.load %arg0[%c0, %c0_0] : memref<16x16xbf16, #tpu.memory_space<vmem>>, vector<16x16xbf16>
    %c0_1 = arith.constant 0 : index
    %c0_2 = arith.constant 0 : index
    %1 = vector.load %arg1[%c0_1, %c0_2] : memref<16x256xbf16, #tpu.memory_space<vmem>>, vector<16x256xbf16>
    %c0_3 = arith.constant 0 : index
    %c0_4 = arith.constant 0 : index
    %2 = vector.load %arg2[%c0_3, %c0_4] : memref<128x128xbf16, #tpu.memory_space<vmem>>, vector<128x128xbf16>
    %3 = vector.extract_strided_slice %1 {offsets = [0, 0], sizes = [16, 128], strides = [1, 1]} : vector<16x256xbf16> to vector<16x128xbf16>
    %cst = arith.constant dense<0.000000e+00> : vector<16x128xf32>
    %4 = tpu.matmul %3, %2, %cst {dimension_numbers = #tpu.dot_dimension_numbers<[1], [0], [0], [1], [0, 0, 1, 1], [], []>} : vector<16x128xbf16>, vector<128x128xbf16>, vector<16x128xf32> -> vector<16x128xf32>
    %5 = vector.extract_strided_slice %1 {offsets = [0, 128], sizes = [16, 128], strides = [1, 1]} : vector<16x256xbf16> to vector<16x128xbf16>
    %cst_5 = arith.constant dense<0.000000e+00> : vector<16x128xf32>
    %6 = tpu.matmul %5, %2, %cst_5 {dimension_numbers = #tpu.dot_dimension_numbers<[1], [0], [0], [1], [0, 0, 1, 1], [], []>} : vector<16x128xbf16>, vector<128x128xbf16>, vector<16x128xf32> -> vector<16x128xf32>
    %7 = tpu.concatenate %4, %6 in 1 : vector<16x128xf32>, vector<16x128xf32> -> vector<16x256xf32>
    %8 = arith.truncf %7 : vector<16x256xf32> to vector<16x256xbf16>
    %cst_6 = arith.constant dense<0.000000e+00> : vector<16x256xf32>
    %9 = tpu.matmul %0, %8, %cst_6 {dimension_numbers = #tpu.dot_dimension_numbers<[1], [0], [0], [1], [0, 0, 1, 1], [], []>} : vector<16x16xbf16>, vector<16x256xbf16>, vector<16x256xf32> -> vector<16x256xf32>
    %c0_7 = arith.constant 0 : index
    %c0_8 = arith.constant 0 : index
    %10 = vector.load %arg3[%c0_7, %c0_8] : memref<1x128xf32, #tpu.memory_space<vmem>>, vector<1x128xf32>
    %11 = tpu.concatenate %10, %10 in 1 : vector<1x128xf32>, vector<1x128xf32> -> vector<1x256xf32>
    %12 = vector.broadcast %11 : vector<1x256xf32> to vector<16x256xf32>
    %13 = arith.addf %9, %12 : vector<16x256xf32>
    %c0_9 = arith.constant 0 : index
    %c0_10 = arith.constant 0 : index
    %14 = vector.load %arg4[%c0_9, %c0_10] : memref<128x128xbf16, #tpu.memory_space<vmem>>, vector<128x128xbf16>
    %15 = vector.extract_strided_slice %13 {offsets = [0, 0], sizes = [16, 128], strides = [1, 1]} : vector<16x256xf32> to vector<16x128xf32>
    %16 = arith.truncf %15 : vector<16x128xf32> to vector<16x128xbf16>
    %cst_11 = arith.constant dense<0.000000e+00> : vector<16x128xf32>
    %17 = tpu.matmul %16, %14, %cst_11 {dimension_numbers = #tpu.dot_dimension_numbers<[1], [0], [0], [1], [0, 0, 1, 1], [], []>} : vector<16x128xbf16>, vector<128x128xbf16>, vector<16x128xf32> -> vector<16x128xf32>
    %18 = vector.extract_strided_slice %13 {offsets = [0, 128], sizes = [16, 128], strides = [1, 1]} : vector<16x256xf32> to vector<16x128xf32>
    %19 = arith.truncf %18 : vector<16x128xf32> to vector<16x128xbf16>
    %cst_12 = arith.constant dense<0.000000e+00> : vector<16x128xf32>
    %20 = tpu.matmul %19, %14, %cst_12 {dimension_numbers = #tpu.dot_dimension_numbers<[1], [0], [0], [1], [0, 0, 1, 1], [], []>} : vector<16x128xbf16>, vector<128x128xbf16>, vector<16x128xf32> -> vector<16x128xf32>
    %21 = tpu.concatenate %17, %20 in 1 : vector<16x128xf32>, vector<16x128xf32> -> vector<16x256xf32>
    %22 = arith.truncf %21 : vector<16x256xf32> to vector<16x256xbf16>
    %cst_13 = arith.constant dense<0.000000e+00> : vector<16x256xf32>
    %23 = tpu.matmul %0, %22, %cst_13 {dimension_numbers = #tpu.dot_dimension_numbers<[1], [0], [0], [1], [0, 0, 1, 1], [], []>} : vector<16x16xbf16>, vector<16x256xbf16>, vector<16x256xf32> -> vector<16x256xf32>
    %c0_14 = arith.constant 0 : index
    %c0_15 = arith.constant 0 : index
    %24 = vector.load %arg5[%c0_14, %c0_15] : memref<1x128xf32, #tpu.memory_space<vmem>>, vector<1x128xf32>
    %25 = tpu.concatenate %24, %24 in 1 : vector<1x128xf32>, vector<1x128xf32> -> vector<1x256xf32>
    %26 = vector.broadcast %25 : vector<1x256xf32> to vector<16x256xf32>
    %27 = arith.addf %23, %26 : vector<16x256xf32>
    %c0_16 = arith.constant 0 : index
    %c0_17 = arith.constant 0 : index
    %28 = vector.load %arg6[%c0_16, %c0_17] : memref<128x128xbf16, #tpu.memory_space<vmem>>, vector<128x128xbf16>
    %29 = vector.extract_strided_slice %27 {offsets = [0, 0], sizes = [16, 128], strides = [1, 1]} : vector<16x256xf32> to vector<16x128xf32>
    %30 = arith.truncf %29 : vector<16x128xf32> to vector<16x128xbf16>
    %cst_18 = arith.constant dense<0.000000e+00> : vector<16x128xf32>
    %31 = tpu.matmul %30, %28, %cst_18 {dimension_numbers = #tpu.dot_dimension_numbers<[1], [0], [0], [1], [0, 0, 1, 1], [], []>} : vector<16x128xbf16>, vector<128x128xbf16>, vector<16x128xf32> -> vector<16x128xf32>
    %32 = vector.extract_strided_slice %27 {offsets = [0, 128], sizes = [16, 128], strides = [1, 1]} : vector<16x256xf32> to vector<16x128xf32>
    %33 = arith.truncf %32 : vector<16x128xf32> to vector<16x128xbf16>
    %cst_19 = arith.constant dense<0.000000e+00> : vector<16x128xf32>
    %34 = tpu.matmul %33, %28, %cst_19 {dimension_numbers = #tpu.dot_dimension_numbers<[1], [0], [0], [1], [0, 0, 1, 1], [], []>} : vector<16x128xbf16>, vector<128x128xbf16>, vector<16x128xf32> -> vector<16x128xf32>
    %35 = tpu.concatenate %31, %34 in 1 : vector<16x128xf32>, vector<16x128xf32> -> vector<16x256xf32>
    %36 = arith.truncf %35 : vector<16x256xf32> to vector<16x256xbf16>
    %cst_20 = arith.constant dense<0.000000e+00> : vector<16x256xf32>
    %37 = tpu.matmul %0, %36, %cst_20 {dimension_numbers = #tpu.dot_dimension_numbers<[1], [0], [0], [1], [0, 0, 1, 1], [], []>} : vector<16x16xbf16>, vector<16x256xbf16>, vector<16x256xf32> -> vector<16x256xf32>
    %c0_21 = arith.constant 0 : index
    %c0_22 = arith.constant 0 : index
    %38 = vector.load %arg7[%c0_21, %c0_22] : memref<1x128xf32, #tpu.memory_space<vmem>>, vector<1x128xf32>
    %39 = tpu.concatenate %38, %38 in 1 : vector<1x128xf32>, vector<1x128xf32> -> vector<1x256xf32>
    %40 = vector.broadcast %39 : vector<1x256xf32> to vector<16x256xf32>
    %41 = arith.addf %37, %40 : vector<16x256xf32>
    %c0_23 = arith.constant 0 : index
    %c0_24 = arith.constant 0 : index
    %42 = vector.load %arg8[%c0_23, %c0_24] : memref<128x128xbf16, #tpu.memory_space<vmem>>, vector<128x128xbf16>
    %43 = vector.extract_strided_slice %41 {offsets = [0, 0], sizes = [16, 128], strides = [1, 1]} : vector<16x256xf32> to vector<16x128xf32>
    %44 = arith.truncf %43 : vector<16x128xf32> to vector<16x128xbf16>
    %cst_25 = arith.constant dense<0.000000e+00> : vector<16x128xf32>
    %45 = tpu.matmul %44, %42, %cst_25 {dimension_numbers = #tpu.dot_dimension_numbers<[1], [0], [0], [1], [0, 0, 1, 1], [], []>} : vector<16x128xbf16>, vector<128x128xbf16>, vector<16x128xf32> -> vector<16x128xf32>
    %46 = vector.extract_strided_slice %41 {offsets = [0, 128], sizes = [16, 128], strides = [1, 1]} : vector<16x256xf32> to vector<16x128xf32>
    %47 = arith.truncf %46 : vector<16x128xf32> to vector<16x128xbf16>
    %cst_26 = arith.constant dense<0.000000e+00> : vector<16x128xf32>
    %48 = tpu.matmul %47, %42, %cst_26 {dimension_numbers = #tpu.dot_dimension_numbers<[1], [0], [0], [1], [0, 0, 1, 1], [], []>} : vector<16x128xbf16>, vector<128x128xbf16>, vector<16x128xf32> -> vector<16x128xf32>
    %49 = tpu.concatenate %45, %48 in 1 : vector<16x128xf32>, vector<16x128xf32> -> vector<16x256xf32>
    %50 = arith.truncf %49 : vector<16x256xf32> to vector<16x256xbf16>
    %cst_27 = arith.constant dense<0.000000e+00> : vector<16x256xf32>
    %51 = tpu.matmul %0, %50, %cst_27 {dimension_numbers = #tpu.dot_dimension_numbers<[1], [0], [0], [1], [0, 0, 1, 1], [], []>} : vector<16x16xbf16>, vector<16x256xbf16>, vector<16x256xf32> -> vector<16x256xf32>
    %c0_28 = arith.constant 0 : index
    %c0_29 = arith.constant 0 : index
    %52 = vector.load %arg9[%c0_28, %c0_29] : memref<1x128xf32, #tpu.memory_space<vmem>>, vector<1x128xf32>
    %53 = tpu.concatenate %52, %52 in 1 : vector<1x128xf32>, vector<1x128xf32> -> vector<1x256xf32>
    %54 = vector.broadcast %53 : vector<1x256xf32> to vector<16x256xf32>
    %55 = arith.addf %51, %54 : vector<16x256xf32>
    %c0_30 = arith.constant 0 : index
    %c0_31 = arith.constant 0 : index
    %56 = vector.load %arg10[%c0_30, %c0_31] : memref<1x128xf32, #tpu.memory_space<vmem>>, vector<1x128xf32>
    %57 = tpu.concatenate %56, %56 in 1 : vector<1x128xf32>, vector<1x128xf32> -> vector<1x256xf32>
    %cst_32 = arith.constant 0.000000e+00 : f32
    %58 = vector.broadcast %cst_32 : f32 to vector<16x256xf32>
    %59 = arith.cmpf ogt, %55, %58 : vector<16x256xf32>
    %60 = vector.broadcast %57 : vector<1x256xf32> to vector<16x256xf32>
    %61 = arith.mulf %60, %55 : vector<16x256xf32>
    %62 = arith.select %59, %55, %61 : vector<16x256xi1>, vector<16x256xf32>
    %63 = vector.extract_strided_slice %62 {offsets = [0, 0], sizes = [16, 128], strides = [1, 1]} : vector<16x256xf32> to vector<16x128xf32>
    %64 = vector.extract_strided_slice %62 {offsets = [0, 128], sizes = [16, 128], strides = [1, 1]} : vector<16x256xf32> to vector<16x128xf32>
    %c0_33 = arith.constant 0 : index
    %c0_34 = arith.constant 0 : index
    %65 = vector.load %arg14[%c0_33, %c0_34] : memref<16x128xf32, #tpu.memory_space<vmem>>, vector<16x128xf32>
    tpu.vector_store %arg14[%c0_33, %c0_34], %63 {strides = array<i32>} : memref<16x128xf32, #tpu.memory_space<vmem>>, vector<16x128xf32>,
    %c0_35 = arith.constant 0 : index
    %c0_36 = arith.constant 0 : index
    %66 = vector.load %arg15[%c0_35, %c0_36] : memref<16x128xf32, #tpu.memory_space<vmem>>, vector<16x128xf32>
    tpu.vector_store %arg15[%c0_35, %c0_36], %64 {strides = array<i32>} : memref<16x128xf32, #tpu.memory_space<vmem>>, vector<16x128xf32>,
    %cst_37 = arith.constant dense<0.000000e+00> : vector<128xf32>
    %67 = vector.multi_reduction <add>, %63, %cst_37 [0] : vector<16x128xf32> to vector<128xf32>
    %68 = vector.shape_cast %67 : vector<128xf32> to vector<1x128xf32>
    %cst_38 = arith.constant 1.600000e+01 : f32
    %69 = vector.broadcast %cst_38 : f32 to vector<1x128xf32>
    %70 = arith.divf %68, %69 : vector<1x128xf32>
    %cst_39 = arith.constant 0.000000e+00 : f32
    %71 = vector.broadcast %cst_39 : f32 to vector<1x128xf32>
    %72 = arith.subf %71, %70 : vector<1x128xf32>
    %73 = math.exp %72 : vector<1x128xf32>
    %cst_40 = arith.constant 1.000000e+00 : f32
    %74 = vector.broadcast %cst_40 : f32 to vector<1x128xf32>
    %75 = arith.addf %74, %73 : vector<1x128xf32>
    %cst_41 = arith.constant 1.000000e+00 : f32
    %76 = vector.broadcast %cst_41 : f32 to vector<1x128xf32>
    %77 = arith.divf %76, %75 : vector<1x128xf32>
    %c0_42 = arith.constant 0 : index
    %c0_43 = arith.constant 0 : index
    %78 = vector.load %arg16[%c0_42, %c0_43] : memref<1x128xf32, #tpu.memory_space<vmem>>, vector<1x128xf32>
    tpu.vector_store %arg16[%c0_42, %c0_43], %77 {strides = array<i32>} : memref<1x128xf32, #tpu.memory_space<vmem>>, vector<1x128xf32>,
    %79 = arith.truncf %63 : vector<16x128xf32> to vector<16x128xbf16>
    %c0_44 = arith.constant 0 : index
    %c0_45 = arith.constant 0 : index
    %80 = vector.load %arg11[%c0_44, %c0_45] : memref<128x128xbf16, #tpu.memory_space<vmem>>, vector<128x128xbf16>
    %cst_46 = arith.constant dense<0.000000e+00> : vector<16x128xf32>
    %81 = tpu.matmul %79, %80, %cst_46 {dimension_numbers = #tpu.dot_dimension_numbers<[1], [0], [0], [1], [0, 0, 1, 1], [], []>} : vector<16x128xbf16>, vector<128x128xbf16>, vector<16x128xf32> -> vector<16x128xf32>
    %82 = arith.truncf %81 : vector<16x128xf32> to vector<16x128xbf16>
    %cst_47 = arith.constant dense<0.000000e+00> : vector<16x128xf32>
    %83 = tpu.matmul %0, %82, %cst_47 {dimension_numbers = #tpu.dot_dimension_numbers<[1], [0], [0], [1], [0, 0, 1, 1], [], []>} : vector<16x16xbf16>, vector<16x128xbf16>, vector<16x128xf32> -> vector<16x128xf32>
    %c0_48 = arith.constant 0 : index
    %c0_49 = arith.constant 0 : index
    %84 = vector.load %arg12[%c0_48, %c0_49] : memref<1x128xf32, #tpu.memory_space<vmem>>, vector<1x128xf32>
    %85 = vector.broadcast %84 : vector<1x128xf32> to vector<16x128xf32>
    %86 = arith.addf %83, %85 : vector<16x128xf32>
    %c0_50 = arith.constant 0 : index
    %c0_51 = arith.constant 0 : index
    %87 = vector.load %arg17[%c0_50, %c0_51] : memref<16x128xf32, #tpu.memory_space<vmem>>, vector<16x128xf32>
    tpu.vector_store %arg17[%c0_50, %c0_51], %86 {strides = array<i32>} : memref<16x128xf32, #tpu.memory_space<vmem>>, vector<16x128xf32>,
    %c0_52 = arith.constant 0 : index
    %c0_53 = arith.constant 0 : index
    %88 = vector.load %arg13[%c0_52, %c0_53] : memref<128x128xf32, #tpu.memory_space<vmem>>, vector<128x128xf32>
    %89 = arith.mulf %86, %86 : vector<16x128xf32>
    %cst_54 = arith.constant dense<0.000000e+00> : vector<16xf32>
    %90 = vector.multi_reduction <add>, %89, %cst_54 [1] : vector<16x128xf32> to vector<16xf32>
    %91 = vector.shape_cast %90 : vector<16xf32> to vector<16x1xf32>
    %92 = arith.mulf %88, %88 : vector<128x128xf32>
    %cst_55 = arith.constant dense<0.000000e+00> : vector<128xf32>
    %93 = vector.multi_reduction <add>, %92, %cst_55 [0] : vector<128x128xf32> to vector<128xf32>
    %94 = vector.shape_cast %93 : vector<128xf32> to vector<1x128xf32>
    %cst_56 = arith.constant dense<0.000000e+00> : vector<16x128xf32>
    %95 = tpu.matmul %86, %88, %cst_56 {dimension_numbers = #tpu.dot_dimension_numbers<[1], [0], [0], [1], [0, 0, 1, 1], [], []>} : vector<16x128xf32>, vector<128x128xf32>, vector<16x128xf32> -> vector<16x128xf32>
    %96 = vector.broadcast %91 : vector<16x1xf32> to vector<16x128xf32>
    %97 = vector.broadcast %94 : vector<1x128xf32> to vector<16x128xf32>
    %98 = arith.addf %96, %97 : vector<16x128xf32>
    %cst_57 = arith.constant 2.000000e+00 : f32
    %99 = vector.broadcast %cst_57 : f32 to vector<16x128xf32>
    %100 = arith.mulf %99, %95 : vector<16x128xf32>
    %101 = arith.subf %98, %100 : vector<16x128xf32>
    %cst_58 = arith.constant 0.000000e+00 : f32
    %102 = vector.broadcast %cst_58 : f32 to vector<16x128xf32>
    %103 = arith.maximumf %101, %102 : vector<16x128xf32>
    %cst_59 = arith.constant 2.000000e-01 : f32
    %104 = vector.broadcast %cst_59 : f32 to vector<16x128xf32>
    %105 = arith.divf %103, %104 : vector<16x128xf32>
    %cst_60 = arith.constant 1.000000e+00 : f32
    %106 = vector.broadcast %cst_60 : f32 to vector<16x128xf32>
    %107 = arith.addf %106, %105 : vector<16x128xf32>
    %cst_61 = arith.constant 9.99999993E-9 : f32
    %108 = vector.broadcast %cst_61 : f32 to vector<16x128xf32>
    %109 = arith.addf %107, %108 : vector<16x128xf32>
    %cst_62 = arith.constant 1.000000e+00 : f32
    %110 = vector.broadcast %cst_62 : f32 to vector<16x128xf32>
    %111 = arith.divf %110, %109 : vector<16x128xf32>
    %112 = math.log %111 : vector<16x128xf32>
    %cst_63 = arith.constant 1.200000e+00 : f32
    %113 = vector.broadcast %cst_63 : f32 to vector<16x128xf32>
    %114 = arith.mulf %113, %112 : vector<16x128xf32>
    %115 = math.exp %114 : vector<16x128xf32>
    %116 = tpu.iota {dimensions = array<i32: 1>} : vector<16x128xi32>
    %c4_i32 = arith.constant 4 : i32
    %117 = vector.broadcast %c4_i32 : i32 to vector<16x128xi32>
    %118 = arith.cmpi slt, %116, %117 : vector<16x128xi32>
    %cst_64 = arith.constant 0.000000e+00 : f32
    %119 = vector.broadcast %cst_64 : f32 to vector<16x128xf32>
    %120 = arith.select %118, %115, %119 : vector<16x128xi1>, vector<16x128xf32>
    %cst_65 = arith.constant dense<0.000000e+00> : vector<16xf32>
    %121 = vector.multi_reduction <add>, %120, %cst_65 [1] : vector<16x128xf32> to vector<16xf32>
    %122 = vector.shape_cast %121 : vector<16xf32> to vector<16x1xf32>
    %123 = vector.broadcast %122 : vector<16x1xf32> to vector<16x128xf32>
    %124 = arith.divf %120, %123 : vector<16x128xf32>
    %c0_66 = arith.constant 0 : index
    %c0_67 = arith.constant 0 : index
    %125 = vector.load %arg18[%c0_66, %c0_67] : memref<16x128xf32, #tpu.memory_space<vmem>>, vector<16x128xf32>
    tpu.vector_store %arg18[%c0_66, %c0_67], %124 {strides = array<i32>} : memref<16x128xf32, #tpu.memory_space<vmem>>, vector<16x128xf32>,
    return
  }
}

</mosaic_0001>

<bundles_post_ra>
// kernel: tpu_custom_call.1
= control target key start
LH: loop header
LB: loop body
LE: loop exit
PB: predicated region body
PF: predicated region fallthrough
CT: control target
= control target key end

     0   :  { %s2674_s0 = inlined_call_operand.hbm [shape: bf16[16,16], index: 0, kind: input, shape index: {}]   ;;  %s2675_s1 = inlined_call_operand.hbm [shape: bf16[16,256], index: 1, kind: input, shape index: {}]   ;;  %s2676_s2 = inlined_call_operand.hbm [shape: bf16[128,128], index: 2, kind: input, shape index: {}]   ;;  %s2677_s3 = inlined_call_operand.vmem [shape: f32[1,128], index: 3, kind: input, shape index: {}]   ;;  %s2678_s4 = inlined_call_operand.hbm [shape: bf16[128,128], index: 4, kind: input, shape index: {}]   ;;  %s2679_s5 = inlined_call_operand.vmem [shape: f32[1,128], index: 5, kind: input, shape index: {}]   ;;  %s2680_s6 = inlined_call_operand.hbm [shape: bf16[128,128], index: 6, kind: input, shape index: {}]   ;;  %s2681_s7 = inlined_call_operand.vmem [shape: f32[1,128], index: 7, kind: input, shape index: {}]   ;;  %s2682_s8 = inlined_call_operand.hbm [shape: bf16[128,128], index: 8, kind: input, shape index: {}]   ;;  %s2683_s9 = inlined_call_operand.vmem [shape: f32[1,128], index: 9, kind: input, shape index: {}]   ;;  %s2684_s10 = inlined_call_operand.vmem [shape: f32[1,128], index: 10, kind: input, shape index: {}]   ;;  %s2685_s11 = inlined_call_operand.hbm [shape: bf16[128,128], index: 11, kind: input, shape index: {}]   ;;  %s2686_s12 = inlined_call_operand.vmem [shape: f32[1,128], index: 12, kind: input, shape index: {}]   ;;  %s2687_s13 = inlined_call_operand.hbm [shape: f32[128,128], index: 13, kind: input, shape index: {}]   ;;  %s2688_s14 = inlined_call_operand.hbm [shape: f32[16,128], index: 14, kind: output, shape index: {0}]   ;;  %s2689_s15 = inlined_call_operand.hbm [shape: f32[16,128], index: 15, kind: output, shape index: {1}]   ;;  %s2690_s16 = inlined_call_operand.hbm [shape: f32[1,128], index: 16, kind: output, shape index: {2}]   ;;  %s2691_s17 = inlined_call_operand.hbm [shape: f32[16,128], index: 17, kind: output, shape index: {3}]   ;;  %s2692_s18 = inlined_call_operand.hbm [shape: f32[16,128], index: 18, kind: output, shape index: {4}]  }
   0x1   :  { %2700 = sst [smem:[#allocation31_spill]] %s2674_s0 }
   0x2   :  { %2701 = sst [smem:[#allocation32_spill]] %s2675_s1 }
   0x3   :  { %2702 = sst [smem:[#allocation33_spill]] %s2676_s2 }
   0x4   :  { %2703 = sst [smem:[#allocation34_spill]] %s2690_s16 }
   0x5   :  { %2704 = sst [smem:[#allocation35_spill]] %s2692_s18 }
   0x6   :  { %24 = vsyncpa [#allocation3], 0 }
   0x7   :  { %25 = vsyncpa [#allocation6], 0 }
   0x8   :  { %26 = vsyncpa [#allocation9], 0 }
   0x9   :  { %27 = vsyncpa [#allocation12], 0 }
   0xa   :  { %28 = vsyncpa [#allocation15], 0 }
   0xb   :  { %29 = vsyncpa [#allocation4], 0 }
   0xc   :  { %30 = vsyncpa [#allocation18], 0 }
   0xd   :  { %31 = vsyncpa [#allocation21], 0  ;;  %s2225_s27 = smov [#allocation5]   ;;  %s2705_s0 = sld [smem:[#allocation32_spill]] }
   0xe   :  { %s49_s28 = sshll.u32 %s2225_s27, 4  ;;  %s50_s28 = int_to_ptr.vmem [resolvable:$true] %s49_s28 }
  0x13   :  { %s1923_s19 = scalar_lea.hbm %s2705_s0, 256 }
  0x14   :  { %p1924_p0 = scmp.ne.s32.totalorder %s2705_s0, %s1923_s19  ;;  %p1927_p1 = scmp.lt.u32.totalorder %s1923_s19, %s2705_s0 }
  0x16   :  { %p1929_p2 = pnand %p1927_p1, %p1924_p0 }
  0x18   :  { %1932 = shalt.err (!%p1929_p2)
}
  0x19   :  { %s1933_s2 = scalar_lea.vmem %s50_s28, 256  ;;  %p1938_p4 = scmp.lt.s32.totalorder %s50_s28, %s50_s28 }
  0x1a   :  { %p1934_p3 = scmp.ne.s32.totalorder %s50_s28, %s1933_s2  ;;  %p1939_p5 = scmp.lt.s32.totalorder %s1933_s2, %s1933_s2 }
  0x1c   :  { %p1940_p6 = por %p1939_p5, %p1938_p4 }
  0x1e   :  { %p1941_p7 = pnand %p1940_p6, %p1934_p3 }
  0x20   :  { %1944 = shalt.err (!%p1941_p7)
}
  0x21   :  { %s2698_s23 = smov 128   ;;  %s2227_s24 = smov 8  }
  0x22   :  { %55 = dma.hbm_to_vmem [thread:$0]  %s2705_s0, 256, %s50_s28, [#allocation6], %s2698_s23, %s2698_s23, %s2227_s24  }
  0x23   :  { %s2228_s27 = smov [#allocation8]   ;;  %s2229_s30 = smov [#allocation11]  }
  0x24   :  { %s75_s29 = sshll.u32 %s2228_s27, 4  ;;  %s103_s19 = sshll.u32 %s2229_s30, 4  ;;  %s76_s29 = int_to_ptr.vmem [resolvable:$true] %s75_s29  ;;  %s104_s19 = int_to_ptr.vmem [resolvable:$true] %s103_s19 }
  0x25   :  { %s1945_s21 = scalar_lea.hbm %s2678_s4, 1024 }
  0x26   :  { %p1946_p8 = scmp.ne.s32.totalorder %s2678_s4, %s1945_s21  ;;  %p1949_p9 = scmp.lt.u32.totalorder %s1945_s21, %s2678_s4 }
  0x28   :  { %p1951_p10 = pnand %p1949_p9, %p1946_p8 }
  0x2a   :  { %1954 = shalt.err (!%p1951_p10)
}
  0x2b   :  { %s1955_s28 = scalar_lea.vmem %s76_s29, 1024  ;;  %p1960_p12 = scmp.lt.s32.totalorder %s76_s29, %s76_s29 }
  0x2c   :  { %p1956_p11 = scmp.ne.s32.totalorder %s76_s29, %s1955_s28  ;;  %p1961_p13 = scmp.lt.s32.totalorder %s1955_s28, %s1955_s28 }
  0x2e   :  { %p1962_p0 = por %p1961_p13, %p1960_p12 }
  0x30   :  { %p1963_p1 = pnand %p1962_p0, %p1956_p11 }
  0x32   :  { %1966 = shalt.err (!%p1963_p1)
}
  0x33   :  { %s2230_s0 = smov 64   ;;  %s2231_s25 = smov 4  }
  0x34   :  { %81 = dma.hbm_to_vmem [thread:$0]  %s2678_s4, 1024, %s76_s29, [#allocation9], %s2230_s0, %s2230_s0, %s2231_s25  }
  0x35   :  { %s1967_s30 = scalar_lea.hbm %s2682_s8, 1024 }
  0x36   :  { %p1968_p2 = scmp.ne.s32.totalorder %s2682_s8, %s1967_s30  ;;  %p1971_p3 = scmp.lt.u32.totalorder %s1967_s30, %s2682_s8 }
  0x38   :  { %p1973_p4 = pnand %p1971_p3, %p1968_p2 }
  0x3a   :  { %1976 = shalt.err (!%p1973_p4)
}
  0x3b   :  { %s1977_s2 = scalar_lea.vmem %s104_s19, 1024  ;;  %p1982_p6 = scmp.lt.s32.totalorder %s104_s19, %s104_s19 }
  0x3c   :  { %p1978_p5 = scmp.ne.s32.totalorder %s104_s19, %s1977_s2  ;;  %p1983_p7 = scmp.lt.s32.totalorder %s1977_s2, %s1977_s2 }
  0x3e   :  { %p1984_p8 = por %p1983_p7, %p1982_p6 }
  0x40   :  { %p1985_p9 = pnand %p1984_p8, %p1978_p5 }
  0x42   :  { %1988 = shalt.err (!%p1985_p9)
}
  0x43   :  { %109 = dma.hbm_to_vmem [thread:$0]  %s2682_s8, 1024, %s104_s19, [#allocation12], %s2230_s0, %s2230_s0, %s2231_s25  }
  0x44   :  { %s2232_s28 = smov [#allocation2]   ;;  %s2233_s27 = smov [#allocation7]  }
  0x45   :  { %s37_s26 = sshll.u32 %s2232_s28, 4  ;;  %s61_s16 = sshll.u32 %s2233_s27, 4  ;;  %s38_s26 = int_to_ptr.vmem [resolvable:$true] %s37_s26  ;;  %s62_s16 = int_to_ptr.vmem [resolvable:$true] %s61_s16 }
  0x46   :  { %s2706_s1 = sld [smem:[#allocation31_spill]] }
  0x4c   :  { %s1989_s20 = scalar_lea.hbm %s2706_s1, 128 }
  0x4d   :  { %p1990_p10 = scmp.ne.s32.totalorder %s2706_s1, %s1989_s20  ;;  %p1993_p11 = scmp.lt.u32.totalorder %s1989_s20, %s2706_s1 }
  0x4f   :  { %p1995_p12 = pnand %p1993_p11, %p1990_p10 }
  0x51   :  { %1998 = shalt.err (!%p1995_p12)
}
  0x52   :  { %s1999_s8 = scalar_lea.vmem %s38_s26, 128  ;;  %p2004_p0 = scmp.lt.s32.totalorder %s38_s26, %s38_s26 }
  0x53   :  { %p2000_p13 = scmp.ne.s32.totalorder %s38_s26, %s1999_s8  ;;  %p2005_p1 = scmp.lt.s32.totalorder %s1999_s8, %s1999_s8 }
  0x55   :  { %p2006_p2 = por %p2005_p1, %p2004_p0 }
  0x57   :  { %p2007_p3 = pnand %p2006_p2, %p2000_p13 }
  0x59   :  { %2010 = shalt.err (!%p2007_p3)
}
  0x5a   :  { %43 = dma.hbm_to_vmem [thread:$0]  %s2706_s1, 128, %s38_s26, [#allocation3], %s2230_s0, %s2230_s0, %s2231_s25  }
  0x5b   :  { %s2707_s28 = sld [smem:[#allocation33_spill]] }
  0x61   :  { %s2011_s27 = scalar_lea.hbm %s2707_s28, 1024 }
  0x62   :  { %p2012_p4 = scmp.ne.s32.totalorder %s2707_s28, %s2011_s27  ;;  %p2015_p5 = scmp.lt.u32.totalorder %s2011_s27, %s2707_s28 }
  0x64   :  { %p2017_p6 = pnand %p2015_p5, %p2012_p4 }
  0x66   :  { %2020 = shalt.err (!%p2017_p6)
}
  0x67   :  { %s2021_s22 = scalar_lea.vmem %s62_s16, 1024  ;;  %p2026_p8 = scmp.lt.s32.totalorder %s62_s16, %s62_s16 }
  0x68   :  { %p2022_p7 = scmp.ne.s32.totalorder %s62_s16, %s2021_s22  ;;  %p2027_p9 = scmp.lt.s32.totalorder %s2021_s22, %s2021_s22 }
  0x6a   :  { %p2028_p10 = por %p2027_p9, %p2026_p8 }
  0x6c   :  { %p2029_p11 = pnand %p2028_p10, %p2022_p7 }
  0x6e   :  { %2032 = shalt.err (!%p2029_p11)
}
  0x6f   :  { %67 = dma.hbm_to_vmem [thread:$0]  %s2707_s28, 1024, %s62_s16, [#allocation6], %s2230_s0, %s2230_s0, %s2231_s25  }
  0x70   :  { %s2234_s2 = smov [#allocation10]   ;;  %s2235_s19 = smov [#allocation13]  }
  0x71   :  { %s89_s8 = sshll.u32 %s2234_s2, 4  ;;  %s119_s4 = sshll.u32 %s2235_s19, 4  ;;  %s90_s8 = int_to_ptr.vmem [resolvable:$true] %s89_s8  ;;  %s120_s4 = int_to_ptr.vmem [resolvable:$true] %s119_s4 }
  0x72   :  { %s2033_s27 = scalar_lea.hbm %s2680_s6, 1024 }
  0x73   :  { %p2034_p12 = scmp.ne.s32.totalorder %s2680_s6, %s2033_s27  ;;  %p2037_p13 = scmp.lt.u32.totalorder %s2033_s27, %s2680_s6 }
  0x75   :  { %p2039_p0 = pnand %p2037_p13, %p2034_p12 }
  0x77   :  { %2042 = shalt.err (!%p2039_p0)
}
  0x78   :  { %s2043_s16 = scalar_lea.vmem %s90_s8, 1024  ;;  %p2048_p2 = scmp.lt.s32.totalorder %s90_s8, %s90_s8 }
  0x79   :  { %p2044_p1 = scmp.ne.s32.totalorder %s90_s8, %s2043_s16  ;;  %p2049_p3 = scmp.lt.s32.totalorder %s2043_s16, %s2043_s16 }
  0x7b   :  { %p2050_p4 = por %p2049_p3, %p2048_p2 }
  0x7d   :  { %p2051_p5 = pnand %p2050_p4, %p2044_p1 }
  0x7f   :  { %2054 = shalt.err (!%p2051_p5)
}
  0x80   :  { %95 = dma.hbm_to_vmem [thread:$0]  %s2680_s6, 1024, %s90_s8, [#allocation9], %s2230_s0, %s2230_s0, %s2231_s25  }
  0x81   :  { %s2055_s2 = scalar_lea.hbm %s2685_s11, 1024 }
  0x82   :  { %p2056_p6 = scmp.ne.s32.totalorder %s2685_s11, %s2055_s2  ;;  %p2059_p7 = scmp.lt.u32.totalorder %s2055_s2, %s2685_s11 }
  0x84   :  { %p2061_p8 = pnand %p2059_p7, %p2056_p6 }
  0x86   :  { %2064 = shalt.err (!%p2061_p8)
}
  0x87   :  { %s2065_s18 = scalar_lea.vmem %s120_s4, 1024  ;;  %p2070_p10 = scmp.lt.s32.totalorder %s120_s4, %s120_s4 }
  0x88   :  { %p2066_p9 = scmp.ne.s32.totalorder %s120_s4, %s2065_s18  ;;  %p2071_p11 = scmp.lt.s32.totalorder %s2065_s18, %s2065_s18 }
  0x8a   :  { %p2072_p12 = por %p2071_p11, %p2070_p10 }
  0x8c   :  { %p2073_p13 = pnand %p2072_p12, %p2066_p9 }
  0x8e   :  { %2076 = shalt.err (!%p2073_p13)
}
  0x8f   :  { %125 = dma.hbm_to_vmem [thread:$0]  %s2685_s11, 1024, %s120_s4, [#allocation12], %s2230_s0, %s2230_s0, %s2231_s25  }
  0x90   :  { %s2236_s30 = smov [#allocation14]   ;;  %s2077_s28 = scalar_lea.hbm %s2687_s13, 2048 }
  0x91   :  { %s133_s20 = sshll.u32 %s2236_s30, 4  ;;  %p2078_p0 = scmp.ne.s32.totalorder %s2687_s13, %s2077_s28  ;;  %s134_s20 = int_to_ptr.vmem [resolvable:$true] %s133_s20 }
  0x92   :  { %p2081_p1 = scmp.lt.u32.totalorder %s2077_s28, %s2687_s13 }
  0x94   :  { %p2083_p2 = pnand %p2081_p1, %p2078_p0 }
  0x96   :  { %2086 = shalt.err (!%p2083_p2)
}
  0x97   :  { %s2087_s19 = scalar_lea.vmem %s134_s20, 2048  ;;  %p2092_p4 = scmp.lt.s32.totalorder %s134_s20, %s134_s20 }
  0x98   :  { %p2088_p3 = scmp.ne.s32.totalorder %s134_s20, %s2087_s19  ;;  %p2093_p5 = scmp.lt.s32.totalorder %s2087_s19, %s2087_s19 }
  0x9a   :  { %p2094_p6 = por %p2093_p5, %p2092_p4 }
  0x9c   :  { %p2095_p7 = pnand %p2094_p6, %p2088_p3 }
  0x9e   :  { %2098 = shalt.err (!%p2095_p7)
}
  0x9f   :  { %s2708_s11 = smov 128  }
  0xa0   :  { %139 = dma.hbm_to_vmem [thread:$0]  %s2687_s13, 2048, %s134_s20, [#allocation15], %s2708_s11, %s2708_s11, %s2227_s24  }
  0xa1   :  { %2209 = dma.done.wait [#allocation3], 128  }
  0xa2   :  { %2210 = vsyncadd [#allocation3], 4294967168 }
  0xa3   :  { %2211 = dma.done.wait [#allocation6], 1280  }
  0xa4   :  { %2212 = vsyncadd [#allocation6], 4294966016 }
  0xa5   :  { %2213 = dma.done.wait [#allocation9], 2048  }
  0xa6   :  { %2214 = vsyncadd [#allocation9], 4294965248 }
  0xa7   :  { %2215 = dma.done.wait [#allocation12], 2048  }
  0xa8   :  { %2216 = vsyncadd [#allocation12], 4294965248 }
  0xa9   :  { %2217 = dma.done.wait [#allocation15], 2048  }
  0xaa   :  { %2218 = vsyncadd [#allocation15], 4294965248  ;;  %v2237_v0 = vmov 0.0   ;;  %vm2238_vm0 = vmmov 0   ;;  %v1859_v1 = vld [vmem:[#allocation7] sm:$0xff]   ;;  %v1860_v2 = vld [vmem:[#allocation7 + $0x8] sm:$0xff]  }
  0xab   :  { %1586 = vmatprep.subr.bf16.mxu0 %v2237_v0  ;;  %1606 = vmatprep.subr.bf16.mxu1 %v2237_v0  ;;  %v1861_v3 = vld [vmem:[#allocation7 + $0x10] sm:$0xff]   ;;  %v1862_v4 = vld [vmem:[#allocation7 + $0x18] sm:$0xff]   ;;  %v1863_v5 = vld [vmem:[#allocation7 + $0x20] sm:$0xff]   ;;  %v2239_v11 = vmov 0   ;;  %vm337_vm1 = vcmask 130048   ;;  %s2241_s30 = smov [#allocation20]  }
  0xac   :  { %1602 = vmatprep.mubr.msk.bf16.mxu0 %vm2238_vm0, %v2237_v0  ;;  %1622 = vmatprep.mubr.msk.bf16.mxu1 %vm2238_vm0, %v2237_v0  ;;  %v1864_v6 = vld [vmem:[#allocation7 + $0x28] sm:$0xff]   ;;  %v1865_v7 = vld [vmem:[#allocation7 + $0x30] sm:$0xff]   ;;  %v1866_v8 = vld [vmem:[#allocation7 + $0x38] sm:$0xff]   ;;  %s1389_s20 = sshll.u32 %s2241_s30, 4  ;;  %s2593_s20 = int_to_ptr.vmem [resolvable:$true] %s1389_s20 }
  0xad   :  { %1587 = vmatpush3.bf16.msra.mxu0 %v1859_v1  ;;  %1607 = vmatpush3.bf16.msra.mxu1 %v1859_v1  ;;  %v1867_v9 = vld [vmem:[#allocation5] ss:$8 sps:$4 sm:$0xff]   ;;  %v1869_v10 = vld [vmem:[#allocation5 + $0x4] ss:$8 sps:$4 sm:$0xff]   ;;  %v1871_v12 = vld [vmem:[#allocation8] sm:$0xff]  }
  0xae   :  { %1588 = vmatprep.subr.bf16.mxu0 %v2237_v0  ;;  %1608 = vmatprep.subr.bf16.mxu1 %v2237_v0  ;;  %v1872_v13 = vld [vmem:[#allocation8 + $0x8] sm:$0xff]   ;;  %v1873_v14 = vld [vmem:[#allocation8 + $0x10] sm:$0xff]   ;;  %v1874_v15 = vld [vmem:[#allocation8 + $0x18] sm:$0xff]  }
  0xaf   :  { %v1875_v16 = vld [vmem:[#allocation8 + $0x20] sm:$0xff]   ;;  %v1876_v17 = vld [vmem:[#allocation8 + $0x28] sm:$0xff]   ;;  %v1877_v29 = vld [vmem:[#allocation8 + $0x30] sm:$0xff]  }
  0xb0   :  { %v2490_v28 = vld [vmem:[#allocation2] sm:$0xff]   ;;  %v1878_v30 = vld [vmem:[#allocation8 + $0x38] sm:$0xff]   ;;  %v1879_v42 = vld [vmem:[#allocation10] sm:$0xff]  }
  0xb1   :  { %1589 = vmatpush3.bf16.msra.mxu0 %v1860_v2  ;;  %1609 = vmatpush3.bf16.msra.mxu1 %v1860_v2  ;;  %v1441_v31 = vld [vmem:[%s2677_s3] ss:$0 sm:$0xff]  ;;  %v1881_v44 = vld [vmem:[#allocation10 + $0x10] sm:$0xff]   ;;  %v1882_v45 = vld [vmem:[#allocation10 + $0x18] sm:$0xff]  }
  0xb2   :  { %1590 = vmatprep.subr.bf16.mxu0 %v2237_v0  ;;  %1610 = vmatprep.subr.bf16.mxu1 %v2237_v0  ;;  %v1880_v43 = vld [vmem:[#allocation10 + $0x8] sm:$0xff]   ;;  %v1883_v46 = vld [vmem:[#allocation10 + $0x20] sm:$0xff]   ;;  %v1885_v58 = vld [vmem:[#allocation10 + $0x30] sm:$0xff]  }
  0xb3   :  { %v1884_v47 = vld [vmem:[#allocation10 + $0x28] sm:$0xff]   ;;  %v1886_v59 = vld [vmem:[#allocation10 + $0x38] sm:$0xff]  }
  0xb4   :  { %v1452_v60 = vld [vmem:[%s2679_s5] ss:$0 sm:$0xff] }
  0xb5   :  { %1591 = vmatpush3.bf16.msra.mxu0 %v1861_v3  ;;  %1611 = vmatpush3.bf16.msra.mxu1 %v1861_v3 }
  0xb6   :  { %1592 = vmatprep.subr.bf16.mxu0 %v2237_v0  ;;  %1612 = vmatprep.subr.bf16.mxu1 %v2237_v0 }
  0xb9   :  { %1593 = vmatpush3.bf16.msra.mxu0 %v1862_v4  ;;  %1613 = vmatpush3.bf16.msra.mxu1 %v1862_v4 }
  0xba   :  { %1594 = vmatprep.subr.bf16.mxu0 %v2237_v0  ;;  %1614 = vmatprep.subr.bf16.mxu1 %v2237_v0 }
  0xbd   :  { %1595 = vmatpush3.bf16.msra.mxu0 %v1863_v5  ;;  %1615 = vmatpush3.bf16.msra.mxu1 %v1863_v5 }
  0xbe   :  { %1596 = vmatprep.subr.bf16.mxu0 %v2237_v0  ;;  %1616 = vmatprep.subr.bf16.mxu1 %v2237_v0 }
  0xc1   :  { %1597 = vmatpush3.bf16.msra.mxu0 %v1864_v6  ;;  %1617 = vmatpush3.bf16.msra.mxu1 %v1864_v6 }
  0xc2   :  { %1598 = vmatprep.subr.bf16.mxu0 %v2237_v0  ;;  %1618 = vmatprep.subr.bf16.mxu1 %v2237_v0 }
  0xc5   :  { %1599 = vmatpush3.bf16.msra.mxu0 %v1865_v7  ;;  %1619 = vmatpush3.bf16.msra.mxu1 %v1865_v7 }
  0xc6   :  { %1600 = vmatprep.subr.bf16.mxu0 %v2237_v0  ;;  %1620 = vmatprep.subr.bf16.mxu1 %v2237_v0 }
  0xc9   :  { %1601 = vmatpush3.bf16.msra.mxu0 %v1866_v8  ;;  %1621 = vmatpush3.bf16.msra.mxu1 %v1866_v8  ;;  %v1887_v8 = vld [vmem:[#allocation11] sm:$0xff]  }
  0xca   :  { %1626 = vmatprep.subr.bf16.mxu1 %v2237_v0 }
  0xcc   :  { %1603 = vmatmul.mubr.bf16.vlgmr.msra.gmra.mrb[0].mxu0 %v1867_v9  ;;  %1623 = vmatmul.mubr.bf16.vlgmr.msra.gmra.mrb[0].mxu1 %v1869_v10  ;;  %v1888_v9 = vld [vmem:[#allocation11 + $0x8] sm:$0xff]   ;;  %v1889_v10 = vld [vmem:[#allocation11 + $0x10] sm:$0xff]  }
  0xcd   :  { %1642 = vmatprep.mubr.msk.bf16.mxu1 %vm2238_vm0, %v2237_v0  ;;  %373 = vmatprep.mubr.bf16.mxu0 %v2239_v11 }
  0xce   :  { %1627 = vmatpush3.bf16.msra.mxu1 %v1871_v12 }
  0xcf   :  { %1628 = vmatprep.subr.bf16.mxu1 %v2237_v0 }
  0xd2   :  { %1629 = vmatpush3.bf16.msra.mxu1 %v1872_v13 }
  0xd3   :  { %1630 = vmatprep.subr.bf16.mxu1 %v2237_v0 }
  0xd6   :  { %1631 = vmatpush3.bf16.msra.mxu1 %v1873_v14 }
  0xd7   :  { %1632 = vmatprep.subr.bf16.mxu1 %v2237_v0 }
  0xda   :  { %1633 = vmatpush3.bf16.msra.mxu1 %v1874_v15 }
  0xdb   :  { %1634 = vmatprep.subr.bf16.mxu1 %v2237_v0 }
  0xde   :  { %1635 = vmatpush3.bf16.msra.mxu1 %v1875_v16 }
  0xdf   :  { %1636 = vmatprep.subr.bf16.mxu1 %v2237_v0 }
  0xe2   :  { %1637 = vmatpush3.bf16.msra.mxu1 %v1876_v17 }
  0xe3   :  { %1638 = vmatprep.subr.bf16.mxu1 %v2237_v0 }
  0xe6   :  { %1639 = vmatpush3.bf16.msra.mxu1 %v1877_v29 }
  0xe7   :  { %1640 = vmatprep.subr.bf16.mxu1 %v2237_v0 }
  0xea   :  { %1641 = vmatpush3.bf16.msra.mxu1 %v1878_v30 }
 0x19f   :  { %v273_v18 = vpop.f32.mrb[0].mxu0  ;;  %v318_v19 = vpop.f32.mrb[0].mxu1 }
 0x1a0   :  { %v1604_v20 = vpop.f32.mrb[1].mxu0  ;;  %v1624_v21 = vpop.f32.mrb[1].mxu1 }
 0x1a1   :  { %v276_v22 = vpop.f32.mrb[2].mxu0  ;;  %v321_v23 = vpop.f32.mrb[2].mxu1 }
 0x1a2   :  { %v325_v24 = vpack.c.bf16 %v276_v22, %v273_v18  ;;  %v326_v25 = vpack.c.bf16 %v321_v23, %v318_v19  ;;  %v1605_v26 = vpop.f32.mrb[3].mxu0  ;;  %v1625_v27 = vpop.f32.mrb[3].mxu1 }
 0x1a3   :  { %v1894_v26 = vld [vmem:[#allocation11 + $0x38] sm:$0xff]   ;;  %v1462_v27 = vld [vmem:[%s2681_s7] ss:$0 sm:$0xff] }
 0x1a4   :  { %341 = vmatprep.subr.bf16.mxu0 %v326_v25  ;;  %v1893_v25 = vld [vmem:[#allocation11 + $0x30] sm:$0xff]  }
 0x1a5   :  { %342 = vmatpush1.bf16.msra.mxu0 %v325_v24 }
 0x1a6   :  { %1646 = vmatprep.subr.bf16.mxu0 %v2237_v0 }
 0x1a8   :  { %1443 = vmatmul.mubr.msk.bf16.vlgmr.msra.gmra.mrb[4].mxu0 %vm337_vm1, %v2490_v28 }
 0x1a9   :  { %1647 = vmatpush3.bf16.msra.mxu0 %v1871_v12  ;;  %1662 = vmatprep.mubr.msk.bf16.mxu0 %vm2238_vm0, %v2237_v0  ;;  %v1890_v12 = vld [vmem:[#allocation11 + $0x18] sm:$0xff]  }
 0x1aa   :  { %1648 = vmatprep.subr.bf16.mxu0 %v2237_v0 }
 0x1ad   :  { %1649 = vmatpush3.bf16.msra.mxu0 %v1872_v13  ;;  %v1891_v13 = vld [vmem:[#allocation11 + $0x20] sm:$0xff]  }
 0x1ae   :  { %1650 = vmatprep.subr.bf16.mxu0 %v2237_v0 }
 0x1b1   :  { %1651 = vmatpush3.bf16.msra.mxu0 %v1873_v14  ;;  %v1892_v14 = vld [vmem:[#allocation11 + $0x28] sm:$0xff]  }
 0x1b2   :  { %1652 = vmatprep.subr.bf16.mxu0 %v2237_v0 }
 0x1b5   :  { %1653 = vmatpush3.bf16.msra.mxu0 %v1874_v15 }
 0x1b6   :  { %1654 = vmatprep.subr.bf16.mxu0 %v2237_v0 }
 0x1b9   :  { %1655 = vmatpush3.bf16.msra.mxu0 %v1875_v16 }
 0x1ba   :  { %1656 = vmatprep.subr.bf16.mxu0 %v2237_v0 }
 0x1bd   :  { %1657 = vmatpush3.bf16.msra.mxu0 %v1876_v17 }
 0x1be   :  { %1658 = vmatprep.subr.bf16.mxu0 %v2237_v0 }
 0x1c1   :  { %1659 = vmatpush3.bf16.msra.mxu0 %v1877_v29 }
 0x1c2   :  { %1660 = vmatprep.subr.bf16.mxu0 %v2237_v0 }
 0x1c5   :  { %1661 = vmatpush3.bf16.msra.mxu0 %v1878_v30 }
 0x1c6   :  { %1666 = vmatprep.subr.bf16.mxu0 %v2237_v0 }
 0x27b   :  { %v375_v32 = vpop.f32.mrb[4].mxu0 }
 0x27c   :  { %v377_v33 = vpop.f32.mrb[5].mxu0  ;;  %v376_v35 = vadd.f32 %v1441_v31, %v375_v32 }
 0x27d   :  { %v379_v34 = vpop.f32.mrb[6].mxu0  ;;  %v378_v38 = vadd.f32 %v1441_v31, %v377_v33 }
 0x27e   :  { %v380_v36 = vadd.f32 %v1441_v31, %v379_v34  ;;  %v381_v37 = vpop.f32.mrb[7].mxu0 }
 0x27f   :  { %v382_v39 = vadd.f32 %v1441_v31, %v381_v37 }
 0x280   :  { %v400_v40 = vpack.c.bf16 %v380_v36, %v376_v35 }
 0x281   :  { %v490_v41 = vpack.c.bf16 %v382_v39, %v378_v38  ;;  %v1895_v39 = vld [vmem:[#allocation13] sm:$0xff]  }
 0x282   :  { %1643 = vmatmul.mubr.bf16.vlgmr.msra.gmra.mrb[4].mxu1 %v400_v40  ;;  %v1896_v40 = vld [vmem:[#allocation13 + $0x8] sm:$0xff]  }
 0x283   :  { %1663 = vmatmul.mubr.bf16.vlgmr.msra.gmra.mrb[8].mxu0 %v490_v41  ;;  %571 = vmatprep.mubr.bf16.mxu1 %v2239_v11  ;;  %v1897_v41 = vld [vmem:[#allocation13 + $0x10] sm:$0xff]  }
 0x284   :  { %1682 = vmatprep.mubr.msk.bf16.mxu0 %vm2238_vm0, %v2237_v0  ;;  %1667 = vmatpush3.bf16.msra.mxu0 %v1879_v42 }
 0x285   :  { %1668 = vmatprep.subr.bf16.mxu0 %v2237_v0 }
 0x288   :  { %1669 = vmatpush3.bf16.msra.mxu0 %v1880_v43 }
 0x289   :  { %1670 = vmatprep.subr.bf16.mxu0 %v2237_v0 }
 0x28c   :  { %1671 = vmatpush3.bf16.msra.mxu0 %v1881_v44 }
 0x28d   :  { %1672 = vmatprep.subr.bf16.mxu0 %v2237_v0 }
 0x290   :  { %1673 = vmatpush3.bf16.msra.mxu0 %v1882_v45 }
 0x291   :  { %1674 = vmatprep.subr.bf16.mxu0 %v2237_v0 }
 0x294   :  { %1675 = vmatpush3.bf16.msra.mxu0 %v1883_v46 }
 0x295   :  { %1676 = vmatprep.subr.bf16.mxu0 %v2237_v0 }
 0x298   :  { %1677 = vmatpush3.bf16.msra.mxu0 %v1884_v47 }
 0x299   :  { %1678 = vmatprep.subr.bf16.mxu0 %v2237_v0 }
 0x29c   :  { %1679 = vmatpush3.bf16.msra.mxu0 %v1885_v58 }
 0x29d   :  { %1680 = vmatprep.subr.bf16.mxu0 %v2237_v0 }
 0x2a0   :  { %1681 = vmatpush3.bf16.msra.mxu0 %v1886_v59 }
 0x355   :  { %v483_v48 = vpop.f32.mrb[4].mxu1 }
 0x356   :  { %v1644_v49 = vpop.f32.mrb[5].mxu1  ;;  %v525_v50 = vpop.f32.mrb[8].mxu0 }
 0x357   :  { %v486_v51 = vpop.f32.mrb[6].mxu1  ;;  %v1664_v52 = vpop.f32.mrb[9].mxu0 }
 0x358   :  { %v532_v53 = vpack.c.bf16 %v486_v51, %v483_v48  ;;  %v1645_v54 = vpop.f32.mrb[7].mxu1  ;;  %v528_v55 = vpop.f32.mrb[10].mxu0 }
 0x359   :  { %v533_v56 = vpack.c.bf16 %v528_v55, %v525_v50  ;;  %v1665_v57 = vpop.f32.mrb[11].mxu0  ;;  %v1901_v54 = vld [vmem:[#allocation13 + $0x30] sm:$0xff]   ;;  %v1902_v55 = vld [vmem:[#allocation13 + $0x38] sm:$0xff]  }
 0x35b   :  { %539 = vmatprep.subr.bf16.mxu1 %v533_v56  ;;  %v1472_v56 = vld [vmem:[%s2683_s9] ss:$0 sm:$0xff] }
 0x35c   :  { %540 = vmatpush1.bf16.msra.mxu1 %v532_v53 }
 0x35d   :  { %1686 = vmatprep.subr.bf16.mxu1 %v2237_v0 }
 0x35f   :  { %1453 = vmatmul.mubr.msk.bf16.vlgmr.msra.gmra.mrb[8].mxu1 %vm337_vm1, %v2490_v28 }
 0x360   :  { %1687 = vmatpush3.bf16.msra.mxu1 %v1879_v42  ;;  %1702 = vmatprep.mubr.msk.bf16.mxu1 %vm2238_vm0, %v2237_v0  ;;  %v1898_v42 = vld [vmem:[#allocation13 + $0x18] sm:$0xff]  }
 0x361   :  { %1688 = vmatprep.subr.bf16.mxu1 %v2237_v0 }
 0x364   :  { %1689 = vmatpush3.bf16.msra.mxu1 %v1880_v43  ;;  %v1899_v43 = vld [vmem:[#allocation13 + $0x20] sm:$0xff]  }
 0x365   :  { %1690 = vmatprep.subr.bf16.mxu1 %v2237_v0 }
 0x368   :  { %1691 = vmatpush3.bf16.msra.mxu1 %v1881_v44 }
 0x369   :  { %1692 = vmatprep.subr.bf16.mxu1 %v2237_v0 }
 0x36c   :  { %1693 = vmatpush3.bf16.msra.mxu1 %v1882_v45 }
 0x36d   :  { %1694 = vmatprep.subr.bf16.mxu1 %v2237_v0 }
 0x370   :  { %1695 = vmatpush3.bf16.msra.mxu1 %v1883_v46 }
 0x371   :  { %1696 = vmatprep.subr.bf16.mxu1 %v2237_v0 }
 0x374   :  { %1697 = vmatpush3.bf16.msra.mxu1 %v1884_v47 }
 0x375   :  { %1698 = vmatprep.subr.bf16.mxu1 %v2237_v0 }
 0x378   :  { %1699 = vmatpush3.bf16.msra.mxu1 %v1885_v58  ;;  %v1474_v58 = vld [vmem:[%s2684_s10] ss:$0 sm:$0xff] }
 0x379   :  { %1700 = vmatprep.subr.bf16.mxu1 %v2237_v0 }
 0x37c   :  { %1701 = vmatpush3.bf16.msra.mxu1 %v1886_v59 }
 0x37d   :  { %1706 = vmatprep.subr.bf16.mxu1 %v2237_v0 }
 0x432   :  { %v573_v61 = vpop.f32.mrb[8].mxu1 }
 0x433   :  { %v575_v62 = vpop.f32.mrb[9].mxu1  ;;  %v574_v1 = vadd.f32 %v1452_v60, %v573_v61 }
 0x434   :  { %v577_v63 = vpop.f32.mrb[10].mxu1  ;;  %v576_v4 = vadd.f32 %v1452_v60, %v575_v62 }
 0x435   :  { %v578_v2 = vadd.f32 %v1452_v60, %v577_v63  ;;  %v579_v3 = vpop.f32.mrb[11].mxu1 }
 0x436   :  { %v580_v5 = vadd.f32 %v1452_v60, %v579_v3 }
 0x437   :  { %v598_v6 = vpack.c.bf16 %v578_v2, %v574_v1 }
 0x438   :  { %v688_v7 = vpack.c.bf16 %v580_v5, %v576_v4 }
 0x439   :  { %1683 = vmatmul.mubr.bf16.vlgmr.msra.gmra.mrb[12].mxu0 %v598_v6 }
 0x43a   :  { %1703 = vmatmul.mubr.bf16.vlgmr.msra.gmra.mrb[12].mxu1 %v688_v7  ;;  %769 = vmatprep.mubr.bf16.mxu0 %v2239_v11 }
 0x43b   :  { %1722 = vmatprep.mubr.msk.bf16.mxu1 %vm2238_vm0, %v2237_v0  ;;  %1707 = vmatpush3.bf16.msra.mxu1 %v1887_v8 }
 0x43c   :  { %1708 = vmatprep.subr.bf16.mxu1 %v2237_v0 }
 0x43f   :  { %1709 = vmatpush3.bf16.msra.mxu1 %v1888_v9 }
 0x440   :  { %1710 = vmatprep.subr.bf16.mxu1 %v2237_v0 }
 0x443   :  { %1711 = vmatpush3.bf16.msra.mxu1 %v1889_v10 }
 0x444   :  { %1712 = vmatprep.subr.bf16.mxu1 %v2237_v0 }
 0x447   :  { %1713 = vmatpush3.bf16.msra.mxu1 %v1890_v12 }
 0x448   :  { %1714 = vmatprep.subr.bf16.mxu1 %v2237_v0 }
 0x44b   :  { %1715 = vmatpush3.bf16.msra.mxu1 %v1891_v13 }
 0x44c   :  { %1716 = vmatprep.subr.bf16.mxu1 %v2237_v0 }
 0x44f   :  { %1717 = vmatpush3.bf16.msra.mxu1 %v1892_v14 }
 0x450   :  { %1718 = vmatprep.subr.bf16.mxu1 %v2237_v0 }
 0x453   :  { %1719 = vmatpush3.bf16.msra.mxu1 %v1893_v25 }
 0x454   :  { %1720 = vmatprep.subr.bf16.mxu1 %v2237_v0 }
 0x457   :  { %1721 = vmatpush3.bf16.msra.mxu1 %v1894_v26 }
 0x50c   :  { %v681_v15 = vpop.f32.mrb[12].mxu0 }
 0x50d   :  { %v1684_v16 = vpop.f32.mrb[13].mxu0  ;;  %v723_v17 = vpop.f32.mrb[12].mxu1 }
 0x50e   :  { %v684_v18 = vpop.f32.mrb[14].mxu0  ;;  %v1704_v19 = vpop.f32.mrb[13].mxu1 }
 0x50f   :  { %v730_v20 = vpack.c.bf16 %v684_v18, %v681_v15  ;;  %v1685_v21 = vpop.f32.mrb[15].mxu0  ;;  %v726_v22 = vpop.f32.mrb[14].mxu1 }
 0x510   :  { %v731_v23 = vpack.c.bf16 %v726_v22, %v723_v17  ;;  %v1705_v24 = vpop.f32.mrb[15].mxu1 }
 0x512   :  { %737 = vmatprep.subr.bf16.mxu0 %v731_v23 }
 0x513   :  { %738 = vmatpush1.bf16.msra.mxu0 %v730_v20 }
 0x514   :  { %1726 = vmatprep.subr.bf16.mxu0 %v2237_v0 }
 0x516   :  { %1463 = vmatmul.mubr.msk.bf16.vlgmr.msra.gmra.mrb[16].mxu0 %vm337_vm1, %v2490_v28 }
 0x517   :  { %1727 = vmatpush3.bf16.msra.mxu0 %v1887_v8  ;;  %1742 = vmatprep.mubr.msk.bf16.mxu0 %vm2238_vm0, %v2237_v0 }
 0x518   :  { %1728 = vmatprep.subr.bf16.mxu0 %v2237_v0 }
 0x51b   :  { %1729 = vmatpush3.bf16.msra.mxu0 %v1888_v9 }
 0x51c   :  { %1730 = vmatprep.subr.bf16.mxu0 %v2237_v0 }
 0x51f   :  { %1731 = vmatpush3.bf16.msra.mxu0 %v1889_v10 }
 0x520   :  { %1732 = vmatprep.subr.bf16.mxu0 %v2237_v0 }
 0x523   :  { %1733 = vmatpush3.bf16.msra.mxu0 %v1890_v12 }
 0x524   :  { %1734 = vmatprep.subr.bf16.mxu0 %v2237_v0 }
 0x527   :  { %1735 = vmatpush3.bf16.msra.mxu0 %v1891_v13 }
 0x528   :  { %1736 = vmatprep.subr.bf16.mxu0 %v2237_v0 }
 0x52b   :  { %1737 = vmatpush3.bf16.msra.mxu0 %v1892_v14 }
 0x52c   :  { %1738 = vmatprep.subr.bf16.mxu0 %v2237_v0 }
 0x52f   :  { %1739 = vmatpush3.bf16.msra.mxu0 %v1893_v25  ;;  %v1172_v25 = vld [vmem:[#allocation14] sm:$0xff] }
 0x530   :  { %1740 = vmatprep.subr.bf16.mxu0 %v2237_v0 }
 0x533   :  { %1741 = vmatpush3.bf16.msra.mxu0 %v1894_v26  ;;  %v1173_v26 = vld [vmem:[#allocation14 + $0x8] sm:$0xff] }
 0x534   :  { %1746 = vmatprep.subr.bf16.mxu0 %v2237_v0 }
 0x5e9   :  { %v771_v29 = vpop.f32.mrb[16].mxu0 }
 0x5ea   :  { %v773_v30 = vpop.f32.mrb[17].mxu0  ;;  %v772_v32 = vadd.f32 %v1462_v27, %v771_v29  ;;  %v1195_v29 = vmul.f32 %v1173_v26, %v1173_v26 }
 0x5eb   :  { %v775_v31 = vpop.f32.mrb[18].mxu0  ;;  %v774_v35 = vadd.f32 %v1462_v27, %v773_v30  ;;  %v1174_v30 = vld [vmem:[#allocation14 + $0x10] sm:$0xff] }
 0x5ec   :  { %v776_v33 = vadd.f32 %v1462_v27, %v775_v31  ;;  %v777_v34 = vpop.f32.mrb[19].mxu0  ;;  %v1175_v31 = vld [vmem:[#allocation14 + $0x18] sm:$0xff] }
 0x5ed   :  { %v778_v36 = vadd.f32 %v1462_v27, %v777_v34  ;;  %v1194_v27 = vmul.f32 %v1172_v25, %v1172_v25  ;;  %v1197_v34 = vmul.f32 %v1175_v31, %v1175_v31 }
 0x5ee   :  { %v796_v37 = vpack.c.bf16 %v776_v33, %v772_v32  ;;  %v1196_v32 = vmul.f32 %v1174_v30, %v1174_v30 }
 0x5ef   :  { %v886_v38 = vpack.c.bf16 %v778_v36, %v774_v35  ;;  %v1210_v33 = vadd.f32 %v1195_v29, %v1194_v27  ;;  %v1176_v36 = vld [vmem:[#allocation14 + $0x20] sm:$0xff] }
 0x5f0   :  { %1723 = vmatmul.mubr.bf16.vlgmr.msra.gmra.mrb[16].mxu1 %v796_v37  ;;  %v1177_v37 = vld [vmem:[#allocation14 + $0x28] sm:$0xff] }
 0x5f1   :  { %1743 = vmatmul.mubr.bf16.vlgmr.msra.gmra.mrb[20].mxu0 %v886_v38  ;;  %967 = vmatprep.mubr.bf16.mxu1 %v2239_v11  ;;  %v1900_v11 = vld [vmem:[#allocation13 + $0x28] sm:$0xff]   ;;  %v1211_v35 = vadd.f32 %v1210_v33, %v1196_v32  ;;  %v1198_v38 = vmul.f32 %v1176_v36, %v1176_v36 }
 0x5f2   :  { %1762 = vmatprep.mubr.msk.bf16.mxu0 %vm2238_vm0, %v2237_v0  ;;  %1747 = vmatpush3.bf16.msra.mxu0 %v1895_v39 }
 0x5f3   :  { %1748 = vmatprep.subr.bf16.mxu0 %v2237_v0  ;;  %v1212_v39 = vadd.f32 %v1211_v35, %v1197_v34 }
 0x5f6   :  { %1749 = vmatpush3.bf16.msra.mxu0 %v1896_v40  ;;  %v1199_v40 = vmul.f32 %v1177_v37, %v1177_v37 }
 0x5f7   :  { %1750 = vmatprep.subr.bf16.mxu0 %v2237_v0 }
 0x5fa   :  { %1751 = vmatpush3.bf16.msra.mxu0 %v1897_v41  ;;  %v1213_v41 = vadd.f32 %v1212_v39, %v1198_v38 }
 0x5fb   :  { %1752 = vmatprep.subr.bf16.mxu0 %v2237_v0 }
 0x5fe   :  { %1753 = vmatpush3.bf16.msra.mxu0 %v1898_v42  ;;  %v1178_v42 = vld [vmem:[#allocation14 + $0x30] sm:$0xff] }
 0x5ff   :  { %1754 = vmatprep.subr.bf16.mxu0 %v2237_v0 }
 0x602   :  { %1755 = vmatpush3.bf16.msra.mxu0 %v1899_v43  ;;  %v1179_v43 = vld [vmem:[#allocation14 + $0x38] sm:$0xff] }
 0x603   :  { %1756 = vmatprep.subr.bf16.mxu0 %v2237_v0 }
 0x606   :  { %1757 = vmatpush3.bf16.msra.mxu0 %v1900_v11  ;;  %v1200_v11 = vmul.f32 %v1178_v42, %v1178_v42 }
 0x607   :  { %1758 = vmatprep.subr.bf16.mxu0 %v2237_v0 }
 0x60a   :  { %1759 = vmatpush3.bf16.msra.mxu0 %v1901_v54  ;;  %v1183_v54 = vld [vmem:[#allocation14 + $0x58] sm:$0xff] }
 0x60b   :  { %1760 = vmatprep.subr.bf16.mxu0 %v2237_v0 }
 0x60e   :  { %1761 = vmatpush3.bf16.msra.mxu0 %v1902_v55 }
 0x6c3   :  { %v879_v44 = vpop.f32.mrb[16].mxu1 }
 0x6c4   :  { %v1724_v45 = vpop.f32.mrb[17].mxu1  ;;  %v921_v46 = vpop.f32.mrb[20].mxu0 }
 0x6c5   :  { %v882_v47 = vpop.f32.mrb[18].mxu1  ;;  %v1744_v48 = vpop.f32.mrb[21].mxu0  ;;  %v1201_v45 = vmul.f32 %v1179_v43, %v1179_v43 }
 0x6c6   :  { %v928_v49 = vpack.c.bf16 %v882_v47, %v879_v44  ;;  %v1725_v50 = vpop.f32.mrb[19].mxu1  ;;  %v924_v51 = vpop.f32.mrb[22].mxu0  ;;  %v1214_v44 = vadd.f32 %v1213_v41, %v1199_v40  ;;  %v1180_v47 = vld [vmem:[#allocation14 + $0x40] sm:$0xff]  ;;  %v1181_v48 = vld [vmem:[#allocation14 + $0x48] sm:$0xff] }
 0x6c7   :  { %v929_v52 = vpack.c.bf16 %v924_v51, %v921_v46  ;;  %v1745_v53 = vpop.f32.mrb[23].mxu0  ;;  %v1203_v51 = vmul.f32 %v1181_v48, %v1181_v48 }
 0x6c8   :  { %v1215_v46 = vadd.f32 %v1214_v44, %v1200_v11  ;;  %v1182_v53 = vld [vmem:[#allocation14 + $0x50] sm:$0xff] }
 0x6c9   :  { %935 = vmatprep.subr.bf16.mxu1 %v929_v52  ;;  %v1204_v55 = vmul.f32 %v1182_v53, %v1182_v53 }
 0x6ca   :  { %936 = vmatpush1.bf16.msra.mxu1 %v928_v49  ;;  %v1202_v49 = vmul.f32 %v1180_v47, %v1180_v47  ;;  %v1216_v50 = vadd.f32 %v1215_v46, %v1201_v45 }
 0x6cb   :  { %1766 = vmatprep.subr.bf16.mxu1 %v2237_v0 }
 0x6cc   :  { %v1217_v52 = vadd.f32 %v1216_v50, %v1202_v49 }
 0x6cd   :  { %1473 = vmatmul.mubr.msk.bf16.vlgmr.msra.gmra.mrb[20].mxu1 %vm337_vm1, %v2490_v28 }
 0x6ce   :  { %1768 = vmatprep.mubr.msk.bf16.mxu1 %vm2238_vm0, %v2237_v0 }
 0x7a0   :  { %v969_v57 = vpop.f32.mrb[20].mxu1 }
 0x7a1   :  { %v970_v59 = vadd.f32 %v1472_v56, %v969_v57  ;;  %v971_v60 = vpop.f32.mrb[21].mxu1  ;;  %v1205_v57 = vmul.f32 %v1183_v54, %v1183_v54 }
 0x7a2   :  { %v972_v61 = vadd.f32 %v1472_v56, %v971_v60  ;;  %v973_v62 = vpop.f32.mrb[22].mxu1  ;;  %v1185_v60 = vld [vmem:[#allocation14 + $0x68] sm:$0xff] }
 0x7a3   :  { %vm979_vm2 = vcmp.gt.f32.partialorder %v970_v59, 0.0  ;;  %v987_v63 = vmul.f32 %v1474_v58, %v970_v59  ;;  %v974_v1 = vadd.f32 %v1472_v56, %v973_v62  ;;  %v975_v2 = vpop.f32.mrb[23].mxu1 }
 0x7a4   :  { %vm980_vm3 = vcmp.gt.f32.partialorder %v972_v61, 0.0  ;;  %v988_v0 = vmul.f32 %v1474_v58, %v972_v61  ;;  %v976_v3 = vadd.f32 %v1472_v56, %v975_v2  ;;  %v1218_v56 = vadd.f32 %v1217_v52, %v1203_v51 }
 0x7a5   :  { %v991_v4 = vsel %vm979_vm2, %v970_v59, %v987_v63  ;;  %vm981_vm4 = vcmp.gt.f32.partialorder %v974_v1, 0.0  ;;  %v989_v5 = vmul.f32 %v1474_v58, %v974_v1  ;;  %v1184_v59 = vld [vmem:[#allocation14 + $0x60] sm:$0xff]  ;;  %v1207_v63 = vmul.f32 %v1185_v60, %v1185_v60 }
 0x7a6   :  { %995 = vst [vmem:[#allocation16] sm:$0xff] %v991_v4  ;;  %vm982_vm5 = vcmp.gt.f32.partialorder %v976_v3, 0.0  ;;  %v990_v6 = vmul.f32 %v1474_v58, %v976_v3  ;;  %v992_v7 = vsel %vm980_vm3, %v972_v61, %v988_v0  ;;  %v1219_v58 = vadd.f32 %v1218_v56, %v1204_v55 }
 0x7a7   :  { %v993_v8 = vsel %vm981_vm4, %v974_v1, %v989_v5  ;;  %997 = vst [vmem:[#allocation17] sm:$0xff] %v992_v7  ;;  %v1206_v61 = vmul.f32 %v1184_v59, %v1184_v59  ;;  %v1807_v5 = vpack.c.bf16 %v1173_v26, %v1172_v25 }
 0x7a8   :  { %v999_v9 = vadd.f32 %v993_v8, %v991_v4  ;;  %v1015_v10 = vpack.c.bf16 %v993_v8, %v991_v4  ;;  %996 = vst [vmem:[#allocation16 + $0x8] sm:$0xff] %v993_v8  ;;  %v994_v12 = vsel %vm982_vm5, %v976_v3, %v990_v6  ;;  %v1220_v62 = vadd.f32 %v1219_v58, %v1205_v57 }
 0x7a9   :  { %998 = vst [vmem:[#allocation17 + $0x8] sm:$0xff] %v994_v12  ;;  %v1811_v8 = vpack.c.bf16 %v1175_v31, %v1174_v30  ;;  %v1823_v12 = vpack.c.bf16 %v1181_v48, %v1180_v47 }
 0x7aa   :  { %v1000_v13 = vrot.slane %v999_v9, 4  ;;  %1763 = vmatmul.mubr.bf16.vlgmr.msra.gmra.mrb[24].mxu0 %v1015_v10  ;;  %v1221_v1 = vadd.f32 %v1220_v62, %v1206_v61  ;;  %v1819_v10 = vpack.c.bf16 %v1179_v43, %v1178_v42 }
 0x7ac   :  { %v1001_v14 = vadd.f32 %v1000_v13, %v999_v9  ;;  %v1222_v2 = vadd.f32 %v1221_v1, %v1207_v63  ;;  %v1815_v9 = vpack.c.bf16 %v1177_v37, %v1176_v36  ;;  %v1827_v13 = vpack.c.bf16 %v1183_v54, %v1182_v53 }
 0x7ad   :  { %v1335_v1 = vlaneseq }
 0x7ae   :  { %v1002_v15 = vrot.slane %v1001_v14, 2 }
 0x7b0   :  { %v1003_v16 = vadd.f32 %v1002_v15, %v1001_v14  ;;  %v1831_v14 = vpack.c.bf16 %v1185_v60, %v1184_v59  ;;  %v1186_v15 = vld [vmem:[#allocation14 + $0x70] sm:$0xff] }
 0x7b2   :  { %v1004_v17 = vrot.slane %v1003_v16, 1 }
 0x7b4   :  { %v1005_v18 = vadd.f32 %v1004_v17, %v1003_v16  ;;  %v1208_v17 = vmul.f32 %v1186_v15, %v1186_v15 }
 0x7b6   :  { %v1007_v19 = vmul.f32 0.0625, %v1005_v18 }
 0x7b8   :  { %v1008_v20 = vsub.f32 0.0, %v1007_v19  ;;  %v1223_v19 = vadd.f32 %v1222_v2, %v1208_v17  ;;  %v1336_v2 = vand.u32 127, %v1335_v1 }
 0x7ba   :  { %v1009_v21 = vmul.f32 1.442695, %v1008_v20  ;;  %vm1337_vm6 = vcmp.lt.s32.totalorder %v1336_v2, 4 }
 0x7bc   :  { %1903 = vpow2.f32 %v1009_v21  ;;  %v1483_v21 = vld [vmem:[%s2686_s12] ss:$0 sm:$0xff]  ;;  %s2240_s12 = smov [#allocation17]  }
 0x7bd   :  { %s1367_s8 = sshll.u32 %s2240_s12, 4  ;;  %s1368_s8 = int_to_ptr.vmem [resolvable:$true] %s1367_s8 }
 0x7be   :  { %s2099_s21 = scalar_lea.vmem %s1368_s8, 256  ;;  %p2104_p9 = scmp.lt.s32.totalorder %s1368_s8, %s1368_s8 }
 0x7bf   :  { %p2100_p8 = scmp.ne.s32.totalorder %s1368_s8, %s2099_s21  ;;  %p2105_p10 = scmp.lt.s32.totalorder %s2099_s21, %s2099_s21 }
 0x7c1   :  { %p2106_p11 = por %p2105_p10, %p2104_p9 }
 0x7c3   :  { %p2107_p12 = pnand %p2106_p11, %p2100_p8 }
 0x7c6   :  { %v1904_v22 = vpop.eup %1903 }
 0x7c7   :  { %v1011_v23 = vadd.f32 1.0, %v1904_v22 }
 0x7c9   :  { %1905 = vrcp.f32 %v1011_v23 }
 0x7d3   :  { %v1906_v24 = vpop.eup %1905 }
 0x7d4   :  { %1014 = vst [vmem:[#allocation19] sm:$0x1] %v1906_v24 }
 0x87d   :  { %v1114_v0 = vpop.f32.mrb[24].mxu0 }
 0x87e   :  { %v1764_v3 = vpop.f32.mrb[25].mxu0 }
 0x87f   :  { %v1117_v4 = vpop.f32.mrb[26].mxu0 }
 0x880   :  { %v1121_v6 = vpack.c.bf16 %v1117_v4, %v1114_v0  ;;  %v1765_v7 = vpop.f32.mrb[27].mxu0 }
 0x882   :  { %1767 = vmatpush3.bf16.msra.mxu1 %v1121_v6 }
 0x883   :  { %1808 = vmatprep.subr.bf16.mxu1 %v1807_v5 }
 0x885   :  { %1769 = vmatmul.mubr.msk.bf16.vlgmr.msra.gmra.mrb[24].mxu1 %vm337_vm1, %v2490_v28  ;;  %v1187_v28 = vld [vmem:[#allocation14 + $0x78] sm:$0xff] }
 0x886   :  { %1810 = vmatpush3.bf16.msra.mxu1 %v1807_v5  ;;  %v1835_v16 = vpack.c.bf16 %v1187_v28, %v1186_v15  ;;  %v1209_v18 = vmul.f32 %v1187_v28, %v1187_v28 }
 0x887   :  { %1812 = vmatprep.subr.bf16.mxu1 %v1811_v8 }
 0x888   :  { %v1224_v20 = vadd.f32 %v1223_v19, %v1209_v18 }
 0x88a   :  { %1814 = vmatpush3.bf16.msra.mxu1 %v1811_v8  ;;  %v1225_v31 = vrot.slane %v1224_v20, 4 }
 0x88b   :  { %1816 = vmatprep.subr.bf16.mxu1 %v1815_v9 }
 0x88c   :  { %v1226_v32 = vadd.f32 %v1225_v31, %v1224_v20 }
 0x88e   :  { %1818 = vmatpush3.bf16.msra.mxu1 %v1815_v9  ;;  %v1227_v33 = vrot.slane %v1226_v32, 2 }
 0x88f   :  { %1820 = vmatprep.subr.bf16.mxu1 %v1819_v10 }
 0x890   :  { %v1228_v34 = vadd.f32 %v1227_v33, %v1226_v32 }
 0x892   :  { %1822 = vmatpush3.bf16.msra.mxu1 %v1819_v10  ;;  %v1229_v36 = vrot.slane %v1228_v34, 1 }
 0x893   :  { %1824 = vmatprep.subr.bf16.mxu1 %v1823_v12 }
 0x894   :  { %v1230_v37 = vadd.f32 %v1229_v36, %v1228_v34 }
 0x896   :  { %1826 = vmatpush3.bf16.msra.mxu1 %v1823_v12 }
 0x897   :  { %1828 = vmatprep.subr.bf16.mxu1 %v1827_v13 }
 0x89a   :  { %1830 = vmatpush3.bf16.msra.mxu1 %v1827_v13 }
 0x89b   :  { %1832 = vmatprep.subr.bf16.mxu1 %v1831_v14 }
 0x89e   :  { %1834 = vmatpush3.bf16.msra.mxu1 %v1831_v14 }
 0x89f   :  { %1836 = vmatprep.subr.bf16.mxu1 %v1835_v16 }
 0x8a2   :  { %1838 = vmatpush3.bf16.msra.mxu1 %v1835_v16 }
 0x958   :  { %v1163_v22 = vpop.f32.mrb[24].mxu1 }
 0x959   :  { %v1164_v23 = vadd.f32 %v1483_v21, %v1163_v22  ;;  %v1770_v24 = vpop.f32.mrb[25].mxu1 }
 0x95a   :  { %v1166_v25 = vpop.f32.mrb[26].mxu1 }
 0x95b   :  { %1170 = vst [vmem:[#allocation20] sm:$0xff] %v1164_v23  ;;  %v1167_v26 = vadd.f32 %v1483_v21, %v1166_v25  ;;  %1804 = vmatprep.mubr.f32.mxu1 %v1164_v23  ;;  %v1771_v27 = vpop.f32.mrb[27].mxu1  ;;  %v1188_v29 = vmul.f32 %v1164_v23, %v1164_v23 }
 0x95d   :  { %1171 = vst [vmem:[#allocation20 + $0x8] sm:$0xff] %v1167_v26  ;;  %1805 = vmatmul.mubr.f32.vlgmr.msra.gmra.mrb[28].mxu1 %v1167_v26  ;;  %1190 = vadd.xlane.f32.xlu0 %v1188_v29  ;;  %v1189_v30 = vmul.f32 %v1167_v26, %v1167_v26 }
 0x961   :  { %1192 = vadd.xlane.f32.xlu0 %v1189_v30 }
 0x9ea   :  { %v1191_v35 = vpop.xlane.xlu0 %1190 }
 0x9eb   :  { %v1306_v43 = vadd.f32 %v1230_v37, %v1191_v35 }
 0x9ee   :  { %v1193_v38 = vpop.xlane.xlu0 %1192 }
 0x9ef   :  { %v1307_v40 = vadd.f32 %v1230_v37, %v1193_v38 }
 0xa30   :  { %v1806_v39 = vpop.f32.mrb[28].mxu1 }
 0xa31   :  { %v1309_v41 = vmul.f32 2.0, %v1806_v39  ;;  %v1297_v42 = vpop.f32.mrb[29].mxu1 }
 0xa32   :  { %v1308_v11 = vmul.f32 2.0, %v1297_v42 }
 0xa33   :  { %v1311_v44 = vsub.f32 %v1307_v40, %v1309_v41 }
 0xa34   :  { %v1310_v45 = vsub.f32 %v1306_v43, %v1308_v11 }
 0xa35   :  { %v1313_v46 = vmax.f32 %v1311_v44, 0.0 }
 0xa36   :  { %v1312_v47 = vmax.f32 %v1310_v45, 0.0 }
 0xa37   :  { %v1316_v48 = vmul.f32 5.0, %v1313_v46 }
 0xa38   :  { %v1315_v49 = vmul.f32 5.0, %v1312_v47 }
 0xa39   :  { %v1318_v50 = vadd.f32 1.0, %v1316_v48 }
 0xa3a   :  { %v1317_v51 = vadd.f32 1.0, %v1315_v49 }
 0xa3b   :  { %v1320_v52 = vadd.f32 1e-08, %v1318_v50 }
 0xa3c   :  { %v1319_v53 = vadd.f32 1e-08, %v1317_v51 }
 0xa3d   :  { %1907 = vrcp.f32 %v1320_v52 }
 0xa3e   :  { %1909 = vrcp.f32 %v1319_v53 }
 0xa47   :  { %v1908_v54 = vpop.eup %1907 }
 0xa48   :  { %v1910_v55 = vpop.eup %1909  ;;  %1911 = vlog2.f32 %v1908_v54 }
 0xa49   :  { %1913 = vlog2.f32 %v1910_v55 }
 0xa52   :  { %v1912_v56 = vpop.eup %1911 }
 0xa53   :  { %v1914_v57 = vpop.eup %1913  ;;  %v1328_v58 = vmul.f32 0.6931472, %v1912_v56 }
 0xa54   :  { %v1326_v59 = vmul.f32 0.6931472, %v1914_v57 }
 0xa55   :  { %v1330_v60 = vmul.f32 1.2, %v1328_v58 }
 0xa56   :  { %v1329_v61 = vmul.f32 1.2, %v1326_v59 }
 0xa57   :  { %v1333_v62 = vmul.f32 1.442695, %v1330_v60 }
 0xa58   :  { %v1331_v63 = vmul.f32 1.442695, %v1329_v61 }
 0xa5a   :  { %1915 = vpow2.f32 %v1331_v63 }
 0xa5b   :  { %1917 = vpow2.f32 %v1333_v62 }
 0xa64   :  { %v1916_v0 = vpop.eup %1915 }
 0xa65   :  { %v2587_v3 = vsel %vm1337_vm6, %v1916_v0, 0.0  ;;  %v1918_v4 = vpop.eup %1917 }
 0xa66   :  { %1340 = vadd.xlane.f32.xlu1 %v2587_v3  ;;  %v2590_v5 = vsel %vm1337_vm6, %v1918_v4, 0.0 }
 0xa6a   :  { %1342 = vadd.xlane.f32.xlu1 %v2590_v5 }
 0xa6b   :  { %2110 = shalt.err (!%p2107_p12)
}
 0xa6c   :  { %s2111_s22 = scalar_lea.hbm %s2689_s15, 256 }
 0xa6d   :  { %p2112_p13 = scmp.ne.s32.totalorder %s2689_s15, %s2111_s22  ;;  %p2115_p0 = scmp.lt.u32.totalorder %s2111_s22, %s2689_s15 }
 0xa6f   :  { %p2117_p1 = pnand %p2115_p0, %p2112_p13 }
 0xa71   :  { %2120 = shalt.err (!%p2117_p1)
}
 0xa72   :  { %1373 = dma.vmem_to_hbm [thread:$0]  %s1368_s8, 256, %s2689_s15, [#allocation18], %s2708_s11, %s2708_s11, %s2227_s24  }
 0xa73   :  { %s2121_s13 = scalar_lea.vmem %s2593_s20, 256  ;;  %p2126_p3 = scmp.lt.s32.totalorder %s2593_s20, %s2593_s20 }
 0xa74   :  { %p2122_p2 = scmp.ne.s32.totalorder %s2593_s20, %s2121_s13  ;;  %p2127_p4 = scmp.lt.s32.totalorder %s2121_s13, %s2121_s13 }
 0xa76   :  { %p2128_p5 = por %p2127_p4, %p2126_p3 }
 0xa78   :  { %p2129_p6 = pnand %p2128_p5, %p2122_p2 }
 0xa7a   :  { %2132 = shalt.err (!%p2129_p6)
}
 0xa7b   :  { %s2133_s29 = scalar_lea.hbm %s2691_s17, 256 }
 0xa7c   :  { %p2134_p7 = scmp.ne.s32.totalorder %s2691_s17, %s2133_s29  ;;  %p2137_p8 = scmp.lt.u32.totalorder %s2133_s29, %s2691_s17 }
 0xa7e   :  { %p2139_p9 = pnand %p2137_p8, %p2134_p7 }
 0xa80   :  { %2142 = shalt.err (!%p2139_p9)
}
 0xa81   :  { %1395 = dma.vmem_to_hbm [thread:$0]  %s2593_s20, 256, %s2691_s17, [#allocation21], %s2708_s11, %s2708_s11, %s2227_s24  }
 0xa82   :  { %s2242_s6 = smov [#allocation16]   ;;  %s2243_s10 = smov [#allocation19]  }
 0xa83   :  { %s1355_s9 = sshll.u32 %s2242_s6, 4  ;;  %s1380_s12 = sshll.u32 %s2243_s10, 4  ;;  %s1356_s9 = int_to_ptr.vmem [resolvable:$true] %s1355_s9  ;;  %s1381_s12 = int_to_ptr.vmem [resolvable:$true] %s1380_s12 }
 0xa84   :  { %s2143_s8 = scalar_lea.vmem %s1356_s9, 256  ;;  %p2148_p11 = scmp.lt.s32.totalorder %s1356_s9, %s1356_s9 }
 0xa85   :  { %p2144_p10 = scmp.ne.s32.totalorder %s1356_s9, %s2143_s8  ;;  %p2149_p12 = scmp.lt.s32.totalorder %s2143_s8, %s2143_s8 }
 0xa87   :  { %p2150_p13 = por %p2149_p12, %p2148_p11 }
 0xa89   :  { %p2151_p0 = pnand %p2150_p13, %p2144_p10 }
 0xa8b   :  { %2154 = shalt.err (!%p2151_p0)
}
 0xa8c   :  { %s2155_s16 = scalar_lea.hbm %s2688_s14, 256 }
 0xa8d   :  { %p2156_p1 = scmp.ne.s32.totalorder %s2688_s14, %s2155_s16  ;;  %p2159_p2 = scmp.lt.u32.totalorder %s2155_s16, %s2688_s14 }
 0xa8f   :  { %p2161_p3 = pnand %p2159_p2, %p2156_p1 }
 0xa91   :  { %2164 = shalt.err (!%p2161_p3)
}
 0xa92   :  { %1361 = dma.vmem_to_hbm [thread:$0]  %s1356_s9, 256, %s2688_s14, [#allocation4], %s2708_s11, %s2708_s11, %s2227_s24  }
 0xa93   :  { %s2165_s2 = scalar_lea.vmem %s1381_s12, 16  ;;  %s2169_s19 = scalar_lea.vmem %s1381_s12, 32 }
 0xa94   :  { %p2166_p4 = scmp.ne.s32.totalorder %s1381_s12, %s2165_s2  ;;  %p2170_p5 = scmp.lt.s32.totalorder %s1381_s12, %s1381_s12 }
 0xa95   :  { %p2171_p6 = scmp.lt.s32.totalorder %s2169_s19, %s2165_s2 }
 0xa97   :  { %p2172_p7 = por %p2171_p6, %p2170_p5 }
 0xa99   :  { %p2173_p8 = pnand %p2172_p7, %p2166_p4 }
 0xa9b   :  { %2176 = shalt.err (!%p2173_p8)
}
 0xa9c   :  { %s2709_s13 = sld [smem:[#allocation34_spill]] }
 0xaa2   :  { %s2177_s4 = scalar_lea.hbm %s2709_s13, 16 }
 0xaa3   :  { %p2178_p9 = scmp.ne.s32.totalorder %s2709_s13, %s2177_s4  ;;  %p2181_p10 = scmp.lt.u32.totalorder %s2177_s4, %s2709_s13 }
 0xaa5   :  { %p2183_p11 = pnand %p2181_p10, %p2178_p9 }
 0xaa7   :  { %2186 = shalt.err (!%p2183_p11)
}
 0xaa8   :  { %1383 = dma.vmem_to_hbm [thread:$0]  %s1381_s12, 16, %s2709_s13, [#allocation18]  }
 0xaa9   :  { %s2244_s27 = smov [#allocation22]  }
 0xaaa   :  { %s1401_s15 = sshll.u32 %s2244_s27, 4  ;;  %s1402_s15 = int_to_ptr.vmem [resolvable:$true] %s1401_s15 }
 0xaab   :  { %s2187_s18 = scalar_lea.vmem %s1402_s15, 256  ;;  %p2192_p13 = scmp.lt.s32.totalorder %s1402_s15, %s1402_s15 }
 0xaac   :  { %p2188_p12 = scmp.ne.s32.totalorder %s1402_s15, %s2187_s18  ;;  %p2193_p0 = scmp.lt.s32.totalorder %s2187_s18, %s2187_s18 }
 0xaae   :  { %p2194_p1 = por %p2193_p0, %p2192_p13 }
 0xab0   :  { %p2195_p2 = pnand %p2194_p1, %p2188_p12 }
 0xaf3   :  { %v1341_v6 = vpop.xlane.xlu1 %1340 }
 0xaf4   :  { %1919 = vrcp.f32 %v1341_v6 }
 0xaf7   :  { %v1343_v7 = vpop.xlane.xlu1 %1342 }
 0xaf8   :  { %1921 = vrcp.f32 %v1343_v7 }
 0xafe   :  { %v1920_v8 = vpop.eup %1919 }
 0xaff   :  { %v1345_v9 = vmul.f32 %v1920_v8, %v2587_v3 }
 0xb01   :  { %1348 = vst [vmem:[#allocation22] sm:$0xff] %v1345_v9 }
 0xb02   :  { %v1922_v10 = vpop.eup %1921 }
 0xb03   :  { %v1347_v12 = vmul.f32 %v1922_v10, %v2590_v5 }
 0xb05   :  { %1349 = vst [vmem:[#allocation22 + $0x8] sm:$0xff] %v1347_v12 }
 0xb06   :  { %2198 = shalt.err (!%p2195_p2)
}
 0xb07   :  { %s2710_s10 = sld [smem:[#allocation35_spill]] }
 0xb0d   :  { %s2199_s12 = scalar_lea.hbm %s2710_s10, 256 }
 0xb0e   :  { %p2200_p3 = scmp.ne.s32.totalorder %s2710_s10, %s2199_s12  ;;  %p2203_p4 = scmp.lt.u32.totalorder %s2199_s12, %s2710_s10 }
 0xb10   :  { %p2205_p5 = pnand %p2203_p4, %p2200_p3 }
 0xb12   :  { %2208 = shalt.err (!%p2205_p5)
}
 0xb13   :  { %1407 = dma.vmem_to_hbm [thread:$0]  %s1402_s15, 256, %s2710_s10, [#allocation21], %s2708_s11, %s2708_s11, %s2227_s24  }
 0xb14   :  { %2219 = dma.done.wait [#allocation4], 256  }
 0xb15   :  { %2220 = vsyncadd [#allocation4], 4294967040 }
 0xb16   :  { %2221 = dma.done.wait [#allocation18], 272  }
 0xb17   :  { %2222 = vsyncadd [#allocation18], 4294967024 }
 0xb18   :  { %2223 = dma.done.wait [#allocation21], 512  }
 0xb19   :  { %2224 = vsyncadd [#allocation21], 4294966784 }
 0xb1a   :  { %1423 = vsyncpa [#allocation3], 1 }
 0xb1b   :  { %1424 = vsyncpa [#allocation6], 1 }
 0xb1c   :  { %1425 = vsyncpa [#allocation9], 1 }
 0xb1d   :  { %1426 = vsyncpa [#allocation12], 1 }
 0xb1e   :  { %1427 = vsyncpa [#allocation15], 1 }
 0xb1f   :  { %1428 = vsyncpa [#allocation4], 1 }
 0xb20   :  { %1429 = vsyncpa [#allocation18], 1 }
 0xb21   :  { %1430 = vsyncpa [#allocation21], 1 }

</bundles_post_ra>
